<compile_context>
chip_gen: v7x
topology: tpu7x:2x2x1
jax: 0.10.0
libtpu: 0.0.40
codegen_flags: <defaults>
</compile_context>

<pallas_src>
import functools

import jax
import jax.numpy as jnp
from jax import lax
from jax.experimental import pallas as pl
from jax.experimental.pallas import tpu as pltpu


def _bilstm_kernel(T, B, E, H, x_ref, m_ref, wih_ref, whh_ref, b_ref,
                   h0_ref, c0_ref, out_ref, hn_ref, cn_ref, gx_sc):
    """One grid step == one LSTM direction (0 = forward, 1 = backward)."""
    d = pl.program_id(0)
    G = 4 * H

    # ---- hoisted input projection: one dense matmul for all T steps --------
    # (T*B, E) @ (E, 4H) + bias -> staged in VMEM scratch, read per step.
    gx = jnp.dot(x_ref[...].reshape(T * B, E), wih_ref[...],
                 preferred_element_type=jnp.float32) + b_ref[...]
    gx_sc[...] = gx.reshape(T, B, G)

    whh = whh_ref[...]                      # (H, 4H), pre-transposed on host

    def step(s, carry):
        h, c = carry                        # (B, H), (B, H)
        # actual sequence position (forward: s, backward: T-1-s)
        t_act = s + d * (T - 1 - 2 * s)

        gates = gx_sc[t_act] + jnp.dot(h, whh,
                                       preferred_element_type=jnp.float32)
        # Two full-width activation passes; slice gates afterwards
        # (PyTorch gate order i, f, g, o).
        sg = jax.nn.sigmoid(gates)          # (B, 4H)
        th = jnp.tanh(gates)                # (B, 4H)
        i_g = sg[:, 0 * H:1 * H]
        f_g = sg[:, 1 * H:2 * H]
        g_g = th[:, 2 * H:3 * H]
        o_g = sg[:, 3 * H:4 * H]

        c_new = f_g * c + i_g * g_g
        h_new = o_g * jnp.tanh(c_new)

        m = m_ref[t_act]                    # (B, 1) 1.0 = valid, 0.0 = pad
        h_keep = m * h_new + (1.0 - m) * h  # padded steps hold the state
        c_keep = m * c_new + (1.0 - m) * c

        # pad_packed_sequence -> zeros at padded positions; store stays in the
        # VMEM output block, HBM writeback happens once per direction.
        out_ref[pl.ds(t_act, 1)] = (m * h_new)[None]
        return h_keep, c_keep

    hT, cT = lax.fori_loop(0, T, step, (h0_ref[...], c0_ref[...]), unroll=True)
    hn_ref[...] = hT
    cn_ref[...] = cT


def bilstm_forward(x_tbe, lengths, wih, whh, bias, h0, c0):
    """x_tbe: (T,B,E); wih: (2,4H,E); whh: (2,4H,H); bias: (2,4H); h0/c0: (2,B,H)."""
    T, B, E = x_tbe.shape
    H = whh.shape[-1]
    G = 4 * H

    # Host-side weight pre-transposes (done once, outside the serial loop).
    wih_t = jnp.transpose(wih, (0, 2, 1)).astype(jnp.float32)   # (2, E, 4H)
    whh_t = jnp.transpose(whh, (0, 2, 1)).astype(jnp.float32)   # (2, H, 4H)
    b3 = bias.reshape(2, 1, G).astype(jnp.float32)              # b_ih + b_hh

    # (T, B, 1) validity mask reproduces pack/pad semantics.
    mask = (jnp.arange(T, dtype=jnp.int32)[:, None]
            < lengths.astype(jnp.int32)[None, :]).astype(jnp.float32)[:, :, None]

    kernel = functools.partial(_bilstm_kernel, T, B, E, H)

    out, hn, cn = pl.pallas_call(
        kernel,
        out_shape=(
            jax.ShapeDtypeStruct((2, T, B, H), jnp.float32),
            jax.ShapeDtypeStruct((2, B, H), jnp.float32),
            jax.ShapeDtypeStruct((2, B, H), jnp.float32),
        ),
        grid_spec=pltpu.PrefetchScalarGridSpec(
            num_scalar_prefetch=0,
            grid=(2,),                                            # directions only
            in_specs=[
                pl.BlockSpec((T, B, E), lambda d: (0, 0, 0)),     # x, whole slab
                pl.BlockSpec((T, B, 1), lambda d: (0, 0, 0)),     # validity mask
                pl.BlockSpec((None, E, G), lambda d: (d, 0, 0)),  # W_ih^T per dir
                pl.BlockSpec((None, H, G), lambda d: (d, 0, 0)),  # W_hh^T per dir
                pl.BlockSpec((None, 1, G), lambda d: (d, 0, 0)),  # bias per dir
                pl.BlockSpec((None, B, H), lambda d: (d, 0, 0)),  # h0 per dir
                pl.BlockSpec((None, B, H), lambda d: (d, 0, 0)),  # c0 per dir
            ],
            out_specs=[
                pl.BlockSpec((None, T, B, H), lambda d: (d, 0, 0, 0)),  # outputs
                pl.BlockSpec((None, B, H), lambda d: (d, 0, 0)),        # h_n
                pl.BlockSpec((None, B, H), lambda d: (d, 0, 0)),        # c_n
            ],
            scratch_shapes=[
                pltpu.VMEM((T, B, G), jnp.float32),   # staged input projection
            ],
        ),
        compiler_params=pltpu.CompilerParams(
            dimension_semantics=("parallel",)),       # v7x: fwd/bwd on 2 cores
    )(x_tbe, mask, wih_t, whh_t, b3, h0, c0)
    return out, hn, cn


def _linear_kernel(x_ref, w_ref, o_ref):
    # y = x @ W^T ; W is pre-transposed on the host, so no in-kernel transpose.
    o_ref[...] = jnp.dot(x_ref[...], w_ref[...],
                         preferred_element_type=jnp.float32)


def linear_no_bias(x, w_t, tm=512):
    """x: (M, K); w_t: (K, N) already transposed. Tiled over M, lane-dense N."""
    M, K = x.shape
    N = w_t.shape[1]
    if M % tm != 0:
        tm = M   # small/irregular M -> single block (toy sizes)
    return pl.pallas_call(
        _linear_kernel,
        out_shape=jax.ShapeDtypeStruct((M, N), jnp.float32),
        grid_spec=pltpu.PrefetchScalarGridSpec(
            num_scalar_prefetch=0,
            grid=(M // tm,),
            in_specs=[pl.BlockSpec((tm, K), lambda i: (i, 0)),
                      pl.BlockSpec((K, N), lambda i: (0, 0))],
            out_specs=pl.BlockSpec((tm, N), lambda i: (i, 0)),
        ),
        compiler_params=pltpu.CompilerParams(dimension_semantics=("parallel",)),
    )(x, w_t)


def encoder_forward(params, enc_input, enc_input_len, hidden_state):
    """Mirror of Encoder.forward: returns (enc_outputs, enc_feature, (h_n, c_n))."""
    # Embedding lookup is glue, just like the python list-comp in the torch code.
    emb = params["embedding"][enc_input]          # (B, T, E)
    x_tbe = jnp.transpose(emb, (1, 0, 2))         # (T, B, E), time-major for kernel
    h0, c0 = hidden_state                         # each (2, B, H)

    out, hn, cn = bilstm_forward(x_tbe, enc_input_len,
                                 params["w_ih"], params["w_hh"],
                                 params["bias"], h0, c0)

    B, T = enc_input.shape
    H = params["w_hh"].shape[-1]
    # (2, T, B, H) -> (B, T, 2H): forward dir first H channels, backward last H.
    enc_outputs = jnp.transpose(out, (2, 1, 0, 3)).reshape(B, T, 2 * H)
    enc_feature = linear_no_bias(enc_outputs.reshape(-1, 2 * H),
                                 params["w_h"].T)
    return enc_outputs, enc_feature, (hn, cn)


if __name__ == "__main__":
    B, T, V, E, H = 2, 8, 20, 16, 32   # batch, seq, vocab, emb_size, hid_size
    key = jax.random.PRNGKey(0)
    ks = jax.random.split(key, 8)

    params = {
        "embedding": jax.random.normal(ks[0], (V, E), jnp.float32) * 0.1,
        # stacked forward/backward LSTM weights (PyTorch gate order i,f,g,o)
        "w_ih": jax.random.normal(ks[1], (2, 4 * H, E), jnp.float32) * 0.1,
        "w_hh": jax.random.normal(ks[2], (2, 4 * H, H), jnp.float32) * 0.1,
        "bias": jax.random.normal(ks[3], (2, 4 * H), jnp.float32) * 0.1,  # b_ih+b_hh
        "w_h":  jax.random.normal(ks[4], (2 * H, 2 * H), jnp.float32) * 0.1,
    }

    enc_input = jax.random.randint(ks[5], (B, T), 0, V)
    # sorted descending as pack_padded_sequence requires; max length == T
    enc_input_len = jnp.array([T, T - 3], dtype=jnp.int32)
    h0 = jax.random.normal(ks[6], (2, B, H), jnp.float32) * 0.1
    c0 = jax.random.normal(ks[7], (2, B, H), jnp.float32) * 0.1

    enc_outputs, enc_feature, (hn, cn) = encoder_forward(
        params, enc_input, enc_input_len, (h0, c0))
    jax.block_until_ready((enc_outputs, enc_feature, hn, cn))

    assert enc_outputs.shape == (B, T, 2 * H)
    assert enc_feature.shape == (B * T, 2 * H)
    assert hn.shape == (2, B, H) and cn.shape == (2, B, H)
    # padded positions of the shorter sequence must be zero (pad_packed semantics)
    assert float(jnp.abs(enc_outputs[1, T - 3:, :]).max()) == 0.0
    print("KERNEL_OK")
</pallas_src>

<mosaic_0001>
module attributes {stable_mosaic.version = 11 : i64} {
  func.func @_bilstm_kernel(%arg0: i32, %arg1: memref<8x2x16xf32, #tpu.memory_space<vmem>>, %arg2: memref<8x2x1xf32, #tpu.memory_space<vmem>>, %arg3: memref<1x16x128xf32, #tpu.memory_space<vmem>>, %arg4: memref<1x32x128xf32, #tpu.memory_space<vmem>>, %arg5: memref<1x1x128xf32, #tpu.memory_space<vmem>>, %arg6: memref<1x2x32xf32, #tpu.memory_space<vmem>>, %arg7: memref<1x2x32xf32, #tpu.memory_space<vmem>>, %arg8: memref<1x8x2x32xf32, #tpu.memory_space<vmem>>, %arg9: memref<1x2x32xf32, #tpu.memory_space<vmem>>, %arg10: memref<1x2x32xf32, #tpu.memory_space<vmem>>, %arg11: memref<8x2x128xf32, #tpu.memory_space<vmem>>) attributes {dimension_semantics = [#tpu.dimension_semantics<parallel>], iteration_bounds = array<i64: 2>, scalar_prefetch = 0 : i64, scratch_operands = 1 : i64, tpu.core_type = #tpu.core_type<tc>, window_params = [{pipeline_mode = #tpu.pipeline_mode<synchronous>, transform_indices = @transform_0, window_bounds = array<i64: 8, 2, 16>}, {pipeline_mode = #tpu.pipeline_mode<synchronous>, transform_indices = @transform_1, window_bounds = array<i64: 8, 2, 1>}, {transform_indices = @transform_2, window_bounds = array<i64: 1, 16, 128>}, {transform_indices = @transform_3, window_bounds = array<i64: 1, 32, 128>}, {transform_indices = @transform_4, window_bounds = array<i64: 1, 1, 128>}, {transform_indices = @transform_5, window_bounds = array<i64: 1, 2, 32>}, {transform_indices = @transform_6, window_bounds = array<i64: 1, 2, 32>}, {transform_indices = @transform_7, window_bounds = array<i64: 1, 8, 2, 32>}, {transform_indices = @transform_8, window_bounds = array<i64: 1, 2, 32>}, {transform_indices = @transform_9, window_bounds = array<i64: 1, 2, 32>}]} {
    %c0 = arith.constant 0 : index
    %c0_0 = arith.constant 0 : index
    %c0_1 = arith.constant 0 : index
    %0 = vector.load %arg1[%c0, %c0_0, %c0_1] : memref<8x2x16xf32, #tpu.memory_space<vmem>>, vector<8x2x16xf32>
    %1 = vector.shape_cast %0 : vector<8x2x16xf32> to vector<16x16xf32>
    %c0_2 = arith.constant 0 : index
    %c0_3 = arith.constant 0 : index
    %c0_4 = arith.constant 0 : index
    %2 = vector.load %arg3[%c0_2, %c0_3, %c0_4] : memref<1x16x128xf32, #tpu.memory_space<vmem>>, vector<1x16x128xf32>
    %3 = vector.shape_cast %2 : vector<1x16x128xf32> to vector<16x128xf32>
    %cst = arith.constant dense<0.000000e+00> : vector<16x128xf32>
    %4 = tpu.matmul %1, %3, %cst {dimension_numbers = #tpu.dot_dimension_numbers<[1], [0], [0], [1], [0, 0, 1, 1], [], []>} : vector<16x16xf32>, vector<16x128xf32>, vector<16x128xf32> -> vector<16x128xf32>
    %c0_5 = arith.constant 0 : index
    %c0_6 = arith.constant 0 : index
    %c0_7 = arith.constant 0 : index
    %5 = vector.load %arg5[%c0_5, %c0_6, %c0_7] : memref<1x1x128xf32, #tpu.memory_space<vmem>>, vector<1x1x128xf32>
    %6 = vector.shape_cast %5 : vector<1x1x128xf32> to vector<1x128xf32>
    %7 = vector.broadcast %6 : vector<1x128xf32> to vector<16x128xf32>
    %8 = arith.addf %4, %7 : vector<16x128xf32>
    %9 = vector.shape_cast %8 : vector<16x128xf32> to vector<8x2x128xf32>
    %c0_8 = arith.constant 0 : index
    %c0_9 = arith.constant 0 : index
    %c0_10 = arith.constant 0 : index
    %10 = vector.load %arg11[%c0_8, %c0_9, %c0_10] : memref<8x2x128xf32, #tpu.memory_space<vmem>>, vector<8x2x128xf32>
    tpu.vector_store %arg11[%c0_8, %c0_9, %c0_10], %9 {strides = array<i32>} : memref<8x2x128xf32, #tpu.memory_space<vmem>>, vector<8x2x128xf32>,
    %c0_11 = arith.constant 0 : index
    %c0_12 = arith.constant 0 : index
    %c0_13 = arith.constant 0 : index
    %11 = vector.load %arg4[%c0_11, %c0_12, %c0_13] : memref<1x32x128xf32, #tpu.memory_space<vmem>>, vector<1x32x128xf32>
    %12 = vector.shape_cast %11 : vector<1x32x128xf32> to vector<32x128xf32>
    %c0_14 = arith.constant 0 : index
    %c0_15 = arith.constant 0 : index
    %c0_16 = arith.constant 0 : index
    %13 = vector.load %arg6[%c0_14, %c0_15, %c0_16] : memref<1x2x32xf32, #tpu.memory_space<vmem>>, vector<1x2x32xf32>
    %14 = vector.shape_cast %13 : vector<1x2x32xf32> to vector<2x32xf32>
    %c0_17 = arith.constant 0 : index
    %c0_18 = arith.constant 0 : index
    %c0_19 = arith.constant 0 : index
    %15 = vector.load %arg7[%c0_17, %c0_18, %c0_19] : memref<1x2x32xf32, #tpu.memory_space<vmem>>, vector<1x2x32xf32>
    %16 = vector.shape_cast %15 : vector<1x2x32xf32> to vector<2x32xf32>
    %c0_i32 = arith.constant 0 : i32
    %c2_i32 = arith.constant 2 : i32
    %17 = arith.muli %c2_i32, %c0_i32 : i32
    %c7_i32 = arith.constant 7 : i32
    %18 = arith.subi %c7_i32, %17 : i32
    %19 = arith.muli %arg0, %18 : i32
    %20 = arith.addi %c0_i32, %19 : i32
    %21 = arith.index_cast %20 : i32 to index
    %c0_20 = arith.constant 0 : index
    %c0_21 = arith.constant 0 : index
    %22 = vector.load %arg11[%21, %c0_20, %c0_21] : memref<8x2x128xf32, #tpu.memory_space<vmem>>, vector<1x2x128xf32>
    %23 = vector.shape_cast %22 : vector<1x2x128xf32> to vector<2x128xf32>
    %cst_22 = arith.constant dense<0.000000e+00> : vector<2x128xf32>
    %24 = tpu.matmul %14, %12, %cst_22 {dimension_numbers = #tpu.dot_dimension_numbers<[1], [0], [0], [1], [0, 0, 1, 1], [], []>} : vector<2x32xf32>, vector<32x128xf32>, vector<2x128xf32> -> vector<2x128xf32>
    %25 = arith.addf %23, %24 : vector<2x128xf32>
    %26 = arith.negf %25 : vector<2x128xf32>
    %27 = math.exp %26 : vector<2x128xf32>
    %cst_23 = arith.constant 1.000000e+00 : f32
    %28 = vector.broadcast %cst_23 : f32 to vector<2x128xf32>
    %29 = arith.addf %28, %27 : vector<2x128xf32>
    %30 = arith.divf %28, %29 : vector<2x128xf32>
    %31 = math.tanh %25 : vector<2x128xf32>
    %32 = vector.extract_strided_slice %30 {offsets = [0, 0], sizes = [2, 32], strides = [1, 1]} : vector<2x128xf32> to vector<2x32xf32>
    %33 = vector.extract_strided_slice %30 {offsets = [0, 32], sizes = [2, 32], strides = [1, 1]} : vector<2x128xf32> to vector<2x32xf32>
    %34 = vector.extract_strided_slice %31 {offsets = [0, 64], sizes = [2, 32], strides = [1, 1]} : vector<2x128xf32> to vector<2x32xf32>
    %35 = vector.extract_strided_slice %30 {offsets = [0, 96], sizes = [2, 32], strides = [1, 1]} : vector<2x128xf32> to vector<2x32xf32>
    %36 = arith.mulf %33, %16 : vector<2x32xf32>
    %37 = arith.mulf %32, %34 : vector<2x32xf32>
    %38 = arith.addf %36, %37 : vector<2x32xf32>
    %39 = math.tanh %38 : vector<2x32xf32>
    %40 = arith.mulf %35, %39 : vector<2x32xf32>
    %41 = arith.index_cast %20 : i32 to index
    %c0_24 = arith.constant 0 : index
    %c0_25 = arith.constant 0 : index
    %42 = vector.load %arg2[%41, %c0_24, %c0_25] : memref<8x2x1xf32, #tpu.memory_space<vmem>>, vector<1x2x1xf32>
    %43 = vector.shape_cast %42 : vector<1x2x1xf32> to vector<2x1xf32>
    %44 = vector.broadcast %43 : vector<2x1xf32> to vector<2x32xf32>
    %45 = arith.mulf %44, %40 : vector<2x32xf32>
    %cst_26 = arith.constant 1.000000e+00 : f32
    %46 = vector.broadcast %cst_26 : f32 to vector<2x1xf32>
    %47 = arith.subf %46, %43 : vector<2x1xf32>
    %48 = vector.broadcast %47 : vector<2x1xf32> to vector<2x32xf32>
    %49 = arith.mulf %48, %14 : vector<2x32xf32>
    %50 = arith.addf %45, %49 : vector<2x32xf32>
    %51 = vector.broadcast %43 : vector<2x1xf32> to vector<2x32xf32>
    %52 = arith.mulf %51, %38 : vector<2x32xf32>
    %cst_27 = arith.constant 1.000000e+00 : f32
    %53 = vector.broadcast %cst_27 : f32 to vector<2x1xf32>
    %54 = arith.subf %53, %43 : vector<2x1xf32>
    %55 = vector.broadcast %54 : vector<2x1xf32> to vector<2x32xf32>
    %56 = arith.mulf %55, %16 : vector<2x32xf32>
    %57 = arith.addf %52, %56 : vector<2x32xf32>
    %58 = vector.broadcast %43 : vector<2x1xf32> to vector<2x32xf32>
    %59 = arith.mulf %58, %40 : vector<2x32xf32>
    %60 = vector.shape_cast %59 : vector<2x32xf32> to vector<1x2x32xf32>
    %c0_28 = arith.constant 0 : index
    %61 = arith.index_cast %20 : i32 to index
    %c0_29 = arith.constant 0 : index
    %c0_30 = arith.constant 0 : index
    %62 = vector.load %arg8[%c0_28, %61, %c0_29, %c0_30] : memref<1x8x2x32xf32, #tpu.memory_space<vmem>>, vector<1x1x2x32xf32>
    %63 = vector.shape_cast %62 : vector<1x1x2x32xf32> to vector<1x2x32xf32>
    %64 = vector.shape_cast %60 : vector<1x2x32xf32> to vector<1x1x2x32xf32>
    tpu.vector_store %arg8[%c0_28, %61, %c0_29, %c0_30], %64 {strides = array<i32>} : memref<1x8x2x32xf32, #tpu.memory_space<vmem>>, vector<1x1x2x32xf32>,
    %c1_i32 = arith.constant 1 : i32
    %c2_i32_31 = arith.constant 2 : i32
    %65 = arith.muli %c2_i32_31, %c1_i32 : i32
    %c7_i32_32 = arith.constant 7 : i32
    %66 = arith.subi %c7_i32_32, %65 : i32
    %67 = arith.muli %arg0, %66 : i32
    %68 = arith.addi %c1_i32, %67 : i32
    %69 = arith.index_cast %68 : i32 to index
    %c0_33 = arith.constant 0 : index
    %c0_34 = arith.constant 0 : index
    %70 = vector.load %arg11[%69, %c0_33, %c0_34] : memref<8x2x128xf32, #tpu.memory_space<vmem>>, vector<1x2x128xf32>
    %71 = vector.shape_cast %70 : vector<1x2x128xf32> to vector<2x128xf32>
    %cst_35 = arith.constant dense<0.000000e+00> : vector<2x128xf32>
    %72 = tpu.matmul %50, %12, %cst_35 {dimension_numbers = #tpu.dot_dimension_numbers<[1], [0], [0], [1], [0, 0, 1, 1], [], []>} : vector<2x32xf32>, vector<32x128xf32>, vector<2x128xf32> -> vector<2x128xf32>
    %73 = arith.addf %71, %72 : vector<2x128xf32>
    %74 = arith.negf %73 : vector<2x128xf32>
    %75 = math.exp %74 : vector<2x128xf32>
    %cst_36 = arith.constant 1.000000e+00 : f32
    %76 = vector.broadcast %cst_36 : f32 to vector<2x128xf32>
    %77 = arith.addf %76, %75 : vector<2x128xf32>
    %78 = arith.divf %76, %77 : vector<2x128xf32>
    %79 = math.tanh %73 : vector<2x128xf32>
    %80 = vector.extract_strided_slice %78 {offsets = [0, 0], sizes = [2, 32], strides = [1, 1]} : vector<2x128xf32> to vector<2x32xf32>
    %81 = vector.extract_strided_slice %78 {offsets = [0, 32], sizes = [2, 32], strides = [1, 1]} : vector<2x128xf32> to vector<2x32xf32>
    %82 = vector.extract_strided_slice %79 {offsets = [0, 64], sizes = [2, 32], strides = [1, 1]} : vector<2x128xf32> to vector<2x32xf32>
    %83 = vector.extract_strided_slice %78 {offsets = [0, 96], sizes = [2, 32], strides = [1, 1]} : vector<2x128xf32> to vector<2x32xf32>
    %84 = arith.mulf %81, %57 : vector<2x32xf32>
    %85 = arith.mulf %80, %82 : vector<2x32xf32>
    %86 = arith.addf %84, %85 : vector<2x32xf32>
    %87 = math.tanh %86 : vector<2x32xf32>
    %88 = arith.mulf %83, %87 : vector<2x32xf32>
    %89 = arith.index_cast %68 : i32 to index
    %c0_37 = arith.constant 0 : index
    %c0_38 = arith.constant 0 : index
    %90 = vector.load %arg2[%89, %c0_37, %c0_38] : memref<8x2x1xf32, #tpu.memory_space<vmem>>, vector<1x2x1xf32>
    %91 = vector.shape_cast %90 : vector<1x2x1xf32> to vector<2x1xf32>
    %92 = vector.broadcast %91 : vector<2x1xf32> to vector<2x32xf32>
    %93 = arith.mulf %92, %88 : vector<2x32xf32>
    %cst_39 = arith.constant 1.000000e+00 : f32
    %94 = vector.broadcast %cst_39 : f32 to vector<2x1xf32>
    %95 = arith.subf %94, %91 : vector<2x1xf32>
    %96 = vector.broadcast %95 : vector<2x1xf32> to vector<2x32xf32>
    %97 = arith.mulf %96, %50 : vector<2x32xf32>
    %98 = arith.addf %93, %97 : vector<2x32xf32>
    %99 = vector.broadcast %91 : vector<2x1xf32> to vector<2x32xf32>
    %100 = arith.mulf %99, %86 : vector<2x32xf32>
    %cst_40 = arith.constant 1.000000e+00 : f32
    %101 = vector.broadcast %cst_40 : f32 to vector<2x1xf32>
    %102 = arith.subf %101, %91 : vector<2x1xf32>
    %103 = vector.broadcast %102 : vector<2x1xf32> to vector<2x32xf32>
    %104 = arith.mulf %103, %57 : vector<2x32xf32>
    %105 = arith.addf %100, %104 : vector<2x32xf32>
    %106 = vector.broadcast %91 : vector<2x1xf32> to vector<2x32xf32>
    %107 = arith.mulf %106, %88 : vector<2x32xf32>
    %108 = vector.shape_cast %107 : vector<2x32xf32> to vector<1x2x32xf32>
    %c0_41 = arith.constant 0 : index
    %109 = arith.index_cast %68 : i32 to index
    %c0_42 = arith.constant 0 : index
    %c0_43 = arith.constant 0 : index
    %110 = vector.load %arg8[%c0_41, %109, %c0_42, %c0_43] : memref<1x8x2x32xf32, #tpu.memory_space<vmem>>, vector<1x1x2x32xf32>
    %111 = vector.shape_cast %110 : vector<1x1x2x32xf32> to vector<1x2x32xf32>
    %112 = vector.shape_cast %108 : vector<1x2x32xf32> to vector<1x1x2x32xf32>
    tpu.vector_store %arg8[%c0_41, %109, %c0_42, %c0_43], %112 {strides = array<i32>} : memref<1x8x2x32xf32, #tpu.memory_space<vmem>>, vector<1x1x2x32xf32>,
    %c2_i32_44 = arith.constant 2 : i32
    %c2_i32_45 = arith.constant 2 : i32
    %113 = arith.muli %c2_i32_45, %c2_i32_44 : i32
    %c7_i32_46 = arith.constant 7 : i32
    %114 = arith.subi %c7_i32_46, %113 : i32
    %115 = arith.muli %arg0, %114 : i32
    %116 = arith.addi %c2_i32_44, %115 : i32
    %117 = arith.index_cast %116 : i32 to index
    %c0_47 = arith.constant 0 : index
    %c0_48 = arith.constant 0 : index
    %118 = vector.load %arg11[%117, %c0_47, %c0_48] : memref<8x2x128xf32, #tpu.memory_space<vmem>>, vector<1x2x128xf32>
    %119 = vector.shape_cast %118 : vector<1x2x128xf32> to vector<2x128xf32>
    %cst_49 = arith.constant dense<0.000000e+00> : vector<2x128xf32>
    %120 = tpu.matmul %98, %12, %cst_49 {dimension_numbers = #tpu.dot_dimension_numbers<[1], [0], [0], [1], [0, 0, 1, 1], [], []>} : vector<2x32xf32>, vector<32x128xf32>, vector<2x128xf32> -> vector<2x128xf32>
    %121 = arith.addf %119, %120 : vector<2x128xf32>
    %122 = arith.negf %121 : vector<2x128xf32>
    %123 = math.exp %122 : vector<2x128xf32>
    %cst_50 = arith.constant 1.000000e+00 : f32
    %124 = vector.broadcast %cst_50 : f32 to vector<2x128xf32>
    %125 = arith.addf %124, %123 : vector<2x128xf32>
    %126 = arith.divf %124, %125 : vector<2x128xf32>
    %127 = math.tanh %121 : vector<2x128xf32>
    %128 = vector.extract_strided_slice %126 {offsets = [0, 0], sizes = [2, 32], strides = [1, 1]} : vector<2x128xf32> to vector<2x32xf32>
    %129 = vector.extract_strided_slice %126 {offsets = [0, 32], sizes = [2, 32], strides = [1, 1]} : vector<2x128xf32> to vector<2x32xf32>
    %130 = vector.extract_strided_slice %127 {offsets = [0, 64], sizes = [2, 32], strides = [1, 1]} : vector<2x128xf32> to vector<2x32xf32>
    %131 = vector.extract_strided_slice %126 {offsets = [0, 96], sizes = [2, 32], strides = [1, 1]} : vector<2x128xf32> to vector<2x32xf32>
    %132 = arith.mulf %129, %105 : vector<2x32xf32>
    %133 = arith.mulf %128, %130 : vector<2x32xf32>
    %134 = arith.addf %132, %133 : vector<2x32xf32>
    %135 = math.tanh %134 : vector<2x32xf32>
    %136 = arith.mulf %131, %135 : vector<2x32xf32>
    %137 = arith.index_cast %116 : i32 to index
    %c0_51 = arith.constant 0 : index
    %c0_52 = arith.constant 0 : index
    %138 = vector.load %arg2[%137, %c0_51, %c0_52] : memref<8x2x1xf32, #tpu.memory_space<vmem>>, vector<1x2x1xf32>
    %139 = vector.shape_cast %138 : vector<1x2x1xf32> to vector<2x1xf32>
    %140 = vector.broadcast %139 : vector<2x1xf32> to vector<2x32xf32>
    %141 = arith.mulf %140, %136 : vector<2x32xf32>
    %cst_53 = arith.constant 1.000000e+00 : f32
    %142 = vector.broadcast %cst_53 : f32 to vector<2x1xf32>
    %143 = arith.subf %142, %139 : vector<2x1xf32>
    %144 = vector.broadcast %143 : vector<2x1xf32> to vector<2x32xf32>
    %145 = arith.mulf %144, %98 : vector<2x32xf32>
    %146 = arith.addf %141, %145 : vector<2x32xf32>
    %147 = vector.broadcast %139 : vector<2x1xf32> to vector<2x32xf32>
    %148 = arith.mulf %147, %134 : vector<2x32xf32>
    %cst_54 = arith.constant 1.000000e+00 : f32
    %149 = vector.broadcast %cst_54 : f32 to vector<2x1xf32>
    %150 = arith.subf %149, %139 : vector<2x1xf32>
    %151 = vector.broadcast %150 : vector<2x1xf32> to vector<2x32xf32>
    %152 = arith.mulf %151, %105 : vector<2x32xf32>
    %153 = arith.addf %148, %152 : vector<2x32xf32>
    %154 = vector.broadcast %139 : vector<2x1xf32> to vector<2x32xf32>
    %155 = arith.mulf %154, %136 : vector<2x32xf32>
    %156 = vector.shape_cast %155 : vector<2x32xf32> to vector<1x2x32xf32>
    %c0_55 = arith.constant 0 : index
    %157 = arith.index_cast %116 : i32 to index
    %c0_56 = arith.constant 0 : index
    %c0_57 = arith.constant 0 : index
    %158 = vector.load %arg8[%c0_55, %157, %c0_56, %c0_57] : memref<1x8x2x32xf32, #tpu.memory_space<vmem>>, vector<1x1x2x32xf32>
    %159 = vector.shape_cast %158 : vector<1x1x2x32xf32> to vector<1x2x32xf32>
    %160 = vector.shape_cast %156 : vector<1x2x32xf32> to vector<1x1x2x32xf32>
    tpu.vector_store %arg8[%c0_55, %157, %c0_56, %c0_57], %160 {strides = array<i32>} : memref<1x8x2x32xf32, #tpu.memory_space<vmem>>, vector<1x1x2x32xf32>,
    %c3_i32 = arith.constant 3 : i32
    %c2_i32_58 = arith.constant 2 : i32
    %161 = arith.muli %c2_i32_58, %c3_i32 : i32
    %c7_i32_59 = arith.constant 7 : i32
    %162 = arith.subi %c7_i32_59, %161 : i32
    %163 = arith.muli %arg0, %162 : i32
    %164 = arith.addi %c3_i32, %163 : i32
    %165 = arith.index_cast %164 : i32 to index
    %c0_60 = arith.constant 0 : index
    %c0_61 = arith.constant 0 : index
    %166 = vector.load %arg11[%165, %c0_60, %c0_61] : memref<8x2x128xf32, #tpu.memory_space<vmem>>, vector<1x2x128xf32>
    %167 = vector.shape_cast %166 : vector<1x2x128xf32> to vector<2x128xf32>
    %cst_62 = arith.constant dense<0.000000e+00> : vector<2x128xf32>
    %168 = tpu.matmul %146, %12, %cst_62 {dimension_numbers = #tpu.dot_dimension_numbers<[1], [0], [0], [1], [0, 0, 1, 1], [], []>} : vector<2x32xf32>, vector<32x128xf32>, vector<2x128xf32> -> vector<2x128xf32>
    %169 = arith.addf %167, %168 : vector<2x128xf32>
    %170 = arith.negf %169 : vector<2x128xf32>
    %171 = math.exp %170 : vector<2x128xf32>
    %cst_63 = arith.constant 1.000000e+00 : f32
    %172 = vector.broadcast %cst_63 : f32 to vector<2x128xf32>
    %173 = arith.addf %172, %171 : vector<2x128xf32>
    %174 = arith.divf %172, %173 : vector<2x128xf32>
    %175 = math.tanh %169 : vector<2x128xf32>
    %176 = vector.extract_strided_slice %174 {offsets = [0, 0], sizes = [2, 32], strides = [1, 1]} : vector<2x128xf32> to vector<2x32xf32>
    %177 = vector.extract_strided_slice %174 {offsets = [0, 32], sizes = [2, 32], strides = [1, 1]} : vector<2x128xf32> to vector<2x32xf32>
    %178 = vector.extract_strided_slice %175 {offsets = [0, 64], sizes = [2, 32], strides = [1, 1]} : vector<2x128xf32> to vector<2x32xf32>
    %179 = vector.extract_strided_slice %174 {offsets = [0, 96], sizes = [2, 32], strides = [1, 1]} : vector<2x128xf32> to vector<2x32xf32>
    %180 = arith.mulf %177, %153 : vector<2x32xf32>
    %181 = arith.mulf %176, %178 : vector<2x32xf32>
    %182 = arith.addf %180, %181 : vector<2x32xf32>
    %183 = math.tanh %182 : vector<2x32xf32>
    %184 = arith.mulf %179, %183 : vector<2x32xf32>
    %185 = arith.index_cast %164 : i32 to index
    %c0_64 = arith.constant 0 : index
    %c0_65 = arith.constant 0 : index
    %186 = vector.load %arg2[%185, %c0_64, %c0_65] : memref<8x2x1xf32, #tpu.memory_space<vmem>>, vector<1x2x1xf32>
    %187 = vector.shape_cast %186 : vector<1x2x1xf32> to vector<2x1xf32>
    %188 = vector.broadcast %187 : vector<2x1xf32> to vector<2x32xf32>
    %189 = arith.mulf %188, %184 : vector<2x32xf32>
    %cst_66 = arith.constant 1.000000e+00 : f32
    %190 = vector.broadcast %cst_66 : f32 to vector<2x1xf32>
    %191 = arith.subf %190, %187 : vector<2x1xf32>
    %192 = vector.broadcast %191 : vector<2x1xf32> to vector<2x32xf32>
    %193 = arith.mulf %192, %146 : vector<2x32xf32>
    %194 = arith.addf %189, %193 : vector<2x32xf32>
    %195 = vector.broadcast %187 : vector<2x1xf32> to vector<2x32xf32>
    %196 = arith.mulf %195, %182 : vector<2x32xf32>
    %cst_67 = arith.constant 1.000000e+00 : f32
    %197 = vector.broadcast %cst_67 : f32 to vector<2x1xf32>
    %198 = arith.subf %197, %187 : vector<2x1xf32>
    %199 = vector.broadcast %198 : vector<2x1xf32> to vector<2x32xf32>
    %200 = arith.mulf %199, %153 : vector<2x32xf32>
    %201 = arith.addf %196, %200 : vector<2x32xf32>
    %202 = vector.broadcast %187 : vector<2x1xf32> to vector<2x32xf32>
    %203 = arith.mulf %202, %184 : vector<2x32xf32>
    %204 = vector.shape_cast %203 : vector<2x32xf32> to vector<1x2x32xf32>
    %c0_68 = arith.constant 0 : index
    %205 = arith.index_cast %164 : i32 to index
    %c0_69 = arith.constant 0 : index
    %c0_70 = arith.constant 0 : index
    %206 = vector.load %arg8[%c0_68, %205, %c0_69, %c0_70] : memref<1x8x2x32xf32, #tpu.memory_space<vmem>>, vector<1x1x2x32xf32>
    %207 = vector.shape_cast %206 : vector<1x1x2x32xf32> to vector<1x2x32xf32>
    %208 = vector.shape_cast %204 : vector<1x2x32xf32> to vector<1x1x2x32xf32>
    tpu.vector_store %arg8[%c0_68, %205, %c0_69, %c0_70], %208 {strides = array<i32>} : memref<1x8x2x32xf32, #tpu.memory_space<vmem>>, vector<1x1x2x32xf32>,
    %c4_i32 = arith.constant 4 : i32
    %c2_i32_71 = arith.constant 2 : i32
    %209 = arith.muli %c2_i32_71, %c4_i32 : i32
    %c7_i32_72 = arith.constant 7 : i32
    %210 = arith.subi %c7_i32_72, %209 : i32
    %211 = arith.muli %arg0, %210 : i32
    %212 = arith.addi %c4_i32, %211 : i32
    %213 = arith.index_cast %212 : i32 to index
    %c0_73 = arith.constant 0 : index
    %c0_74 = arith.constant 0 : index
    %214 = vector.load %arg11[%213, %c0_73, %c0_74] : memref<8x2x128xf32, #tpu.memory_space<vmem>>, vector<1x2x128xf32>
    %215 = vector.shape_cast %214 : vector<1x2x128xf32> to vector<2x128xf32>
    %cst_75 = arith.constant dense<0.000000e+00> : vector<2x128xf32>
    %216 = tpu.matmul %194, %12, %cst_75 {dimension_numbers = #tpu.dot_dimension_numbers<[1], [0], [0], [1], [0, 0, 1, 1], [], []>} : vector<2x32xf32>, vector<32x128xf32>, vector<2x128xf32> -> vector<2x128xf32>
    %217 = arith.addf %215, %216 : vector<2x128xf32>
    %218 = arith.negf %217 : vector<2x128xf32>
    %219 = math.exp %218 : vector<2x128xf32>
    %cst_76 = arith.constant 1.000000e+00 : f32
    %220 = vector.broadcast %cst_76 : f32 to vector<2x128xf32>
    %221 = arith.addf %220, %219 : vector<2x128xf32>
    %222 = arith.divf %220, %221 : vector<2x128xf32>
    %223 = math.tanh %217 : vector<2x128xf32>
    %224 = vector.extract_strided_slice %222 {offsets = [0, 0], sizes = [2, 32], strides = [1, 1]} : vector<2x128xf32> to vector<2x32xf32>
    %225 = vector.extract_strided_slice %222 {offsets = [0, 32], sizes = [2, 32], strides = [1, 1]} : vector<2x128xf32> to vector<2x32xf32>
    %226 = vector.extract_strided_slice %223 {offsets = [0, 64], sizes = [2, 32], strides = [1, 1]} : vector<2x128xf32> to vector<2x32xf32>
    %227 = vector.extract_strided_slice %222 {offsets = [0, 96], sizes = [2, 32], strides = [1, 1]} : vector<2x128xf32> to vector<2x32xf32>
    %228 = arith.mulf %225, %201 : vector<2x32xf32>
    %229 = arith.mulf %224, %226 : vector<2x32xf32>
    %230 = arith.addf %228, %229 : vector<2x32xf32>
    %231 = math.tanh %230 : vector<2x32xf32>
    %232 = arith.mulf %227, %231 : vector<2x32xf32>
    %233 = arith.index_cast %212 : i32 to index
    %c0_77 = arith.constant 0 : index
    %c0_78 = arith.constant 0 : index
    %234 = vector.load %arg2[%233, %c0_77, %c0_78] : memref<8x2x1xf32, #tpu.memory_space<vmem>>, vector<1x2x1xf32>
    %235 = vector.shape_cast %234 : vector<1x2x1xf32> to vector<2x1xf32>
    %236 = vector.broadcast %235 : vector<2x1xf32> to vector<2x32xf32>
    %237 = arith.mulf %236, %232 : vector<2x32xf32>
    %cst_79 = arith.constant 1.000000e+00 : f32
    %238 = vector.broadcast %cst_79 : f32 to vector<2x1xf32>
    %239 = arith.subf %238, %235 : vector<2x1xf32>
    %240 = vector.broadcast %239 : vector<2x1xf32> to vector<2x32xf32>
    %241 = arith.mulf %240, %194 : vector<2x32xf32>
    %242 = arith.addf %237, %241 : vector<2x32xf32>
    %243 = vector.broadcast %235 : vector<2x1xf32> to vector<2x32xf32>
    %244 = arith.mulf %243, %230 : vector<2x32xf32>
    %cst_80 = arith.constant 1.000000e+00 : f32
    %245 = vector.broadcast %cst_80 : f32 to vector<2x1xf32>
    %246 = arith.subf %245, %235 : vector<2x1xf32>
    %247 = vector.broadcast %246 : vector<2x1xf32> to vector<2x32xf32>
    %248 = arith.mulf %247, %201 : vector<2x32xf32>
    %249 = arith.addf %244, %248 : vector<2x32xf32>
    %250 = vector.broadcast %235 : vector<2x1xf32> to vector<2x32xf32>
    %251 = arith.mulf %250, %232 : vector<2x32xf32>
    %252 = vector.shape_cast %251 : vector<2x32xf32> to vector<1x2x32xf32>
    %c0_81 = arith.constant 0 : index
    %253 = arith.index_cast %212 : i32 to index
    %c0_82 = arith.constant 0 : index
    %c0_83 = arith.constant 0 : index
    %254 = vector.load %arg8[%c0_81, %253, %c0_82, %c0_83] : memref<1x8x2x32xf32, #tpu.memory_space<vmem>>, vector<1x1x2x32xf32>
    %255 = vector.shape_cast %254 : vector<1x1x2x32xf32> to vector<1x2x32xf32>
    %256 = vector.shape_cast %252 : vector<1x2x32xf32> to vector<1x1x2x32xf32>
    tpu.vector_store %arg8[%c0_81, %253, %c0_82, %c0_83], %256 {strides = array<i32>} : memref<1x8x2x32xf32, #tpu.memory_space<vmem>>, vector<1x1x2x32xf32>,
    %c5_i32 = arith.constant 5 : i32
    %c2_i32_84 = arith.constant 2 : i32
    %257 = arith.muli %c2_i32_84, %c5_i32 : i32
    %c7_i32_85 = arith.constant 7 : i32
    %258 = arith.subi %c7_i32_85, %257 : i32
    %259 = arith.muli %arg0, %258 : i32
    %260 = arith.addi %c5_i32, %259 : i32
    %261 = arith.index_cast %260 : i32 to index
    %c0_86 = arith.constant 0 : index
    %c0_87 = arith.constant 0 : index
    %262 = vector.load %arg11[%261, %c0_86, %c0_87] : memref<8x2x128xf32, #tpu.memory_space<vmem>>, vector<1x2x128xf32>
    %263 = vector.shape_cast %262 : vector<1x2x128xf32> to vector<2x128xf32>
    %cst_88 = arith.constant dense<0.000000e+00> : vector<2x128xf32>
    %264 = tpu.matmul %242, %12, %cst_88 {dimension_numbers = #tpu.dot_dimension_numbers<[1], [0], [0], [1], [0, 0, 1, 1], [], []>} : vector<2x32xf32>, vector<32x128xf32>, vector<2x128xf32> -> vector<2x128xf32>
    %265 = arith.addf %263, %264 : vector<2x128xf32>
    %266 = arith.negf %265 : vector<2x128xf32>
    %267 = math.exp %266 : vector<2x128xf32>
    %cst_89 = arith.constant 1.000000e+00 : f32
    %268 = vector.broadcast %cst_89 : f32 to vector<2x128xf32>
    %269 = arith.addf %268, %267 : vector<2x128xf32>
    %270 = arith.divf %268, %269 : vector<2x128xf32>
    %271 = math.tanh %265 : vector<2x128xf32>
    %272 = vector.extract_strided_slice %270 {offsets = [0, 0], sizes = [2, 32], strides = [1, 1]} : vector<2x128xf32> to vector<2x32xf32>
    %273 = vector.extract_strided_slice %270 {offsets = [0, 32], sizes = [2, 32], strides = [1, 1]} : vector<2x128xf32> to vector<2x32xf32>
    %274 = vector.extract_strided_slice %271 {offsets = [0, 64], sizes = [2, 32], strides = [1, 1]} : vector<2x128xf32> to vector<2x32xf32>
    %275 = vector.extract_strided_slice %270 {offsets = [0, 96], sizes = [2, 32], strides = [1, 1]} : vector<2x128xf32> to vector<2x32xf32>
    %276 = arith.mulf %273, %249 : vector<2x32xf32>
    %277 = arith.mulf %272, %274 : vector<2x32xf32>
    %278 = arith.addf %276, %277 : vector<2x32xf32>
    %279 = math.tanh %278 : vector<2x32xf32>
    %280 = arith.mulf %275, %279 : vector<2x32xf32>
    %281 = arith.index_cast %260 : i32 to index
    %c0_90 = arith.constant 0 : index
    %c0_91 = arith.constant 0 : index
    %282 = vector.load %arg2[%281, %c0_90, %c0_91] : memref<8x2x1xf32, #tpu.memory_space<vmem>>, vector<1x2x1xf32>
    %283 = vector.shape_cast %282 : vector<1x2x1xf32> to vector<2x1xf32>
    %284 = vector.broadcast %283 : vector<2x1xf32> to vector<2x32xf32>
    %285 = arith.mulf %284, %280 : vector<2x32xf32>
    %cst_92 = arith.constant 1.000000e+00 : f32
    %286 = vector.broadcast %cst_92 : f32 to vector<2x1xf32>
    %287 = arith.subf %286, %283 : vector<2x1xf32>
    %288 = vector.broadcast %287 : vector<2x1xf32> to vector<2x32xf32>
    %289 = arith.mulf %288, %242 : vector<2x32xf32>
    %290 = arith.addf %285, %289 : vector<2x32xf32>
    %291 = vector.broadcast %283 : vector<2x1xf32> to vector<2x32xf32>
    %292 = arith.mulf %291, %278 : vector<2x32xf32>
    %cst_93 = arith.constant 1.000000e+00 : f32
    %293 = vector.broadcast %cst_93 : f32 to vector<2x1xf32>
    %294 = arith.subf %293, %283 : vector<2x1xf32>
    %295 = vector.broadcast %294 : vector<2x1xf32> to vector<2x32xf32>
    %296 = arith.mulf %295, %249 : vector<2x32xf32>
    %297 = arith.addf %292, %296 : vector<2x32xf32>
    %298 = vector.broadcast %283 : vector<2x1xf32> to vector<2x32xf32>
    %299 = arith.mulf %298, %280 : vector<2x32xf32>
    %300 = vector.shape_cast %299 : vector<2x32xf32> to vector<1x2x32xf32>
    %c0_94 = arith.constant 0 : index
    %301 = arith.index_cast %260 : i32 to index
    %c0_95 = arith.constant 0 : index
    %c0_96 = arith.constant 0 : index
    %302 = vector.load %arg8[%c0_94, %301, %c0_95, %c0_96] : memref<1x8x2x32xf32, #tpu.memory_space<vmem>>, vector<1x1x2x32xf32>
    %303 = vector.shape_cast %302 : vector<1x1x2x32xf32> to vector<1x2x32xf32>
    %304 = vector.shape_cast %300 : vector<1x2x32xf32> to vector<1x1x2x32xf32>
    tpu.vector_store %arg8[%c0_94, %301, %c0_95, %c0_96], %304 {strides = array<i32>} : memref<1x8x2x32xf32, #tpu.memory_space<vmem>>, vector<1x1x2x32xf32>,
    %c6_i32 = arith.constant 6 : i32
    %c2_i32_97 = arith.constant 2 : i32
    %305 = arith.muli %c2_i32_97, %c6_i32 : i32
    %c7_i32_98 = arith.constant 7 : i32
    %306 = arith.subi %c7_i32_98, %305 : i32
    %307 = arith.muli %arg0, %306 : i32
    %308 = arith.addi %c6_i32, %307 : i32
    %309 = arith.index_cast %308 : i32 to index
    %c0_99 = arith.constant 0 : index
    %c0_100 = arith.constant 0 : index
    %310 = vector.load %arg11[%309, %c0_99, %c0_100] : memref<8x2x128xf32, #tpu.memory_space<vmem>>, vector<1x2x128xf32>
    %311 = vector.shape_cast %310 : vector<1x2x128xf32> to vector<2x128xf32>
    %cst_101 = arith.constant dense<0.000000e+00> : vector<2x128xf32>
    %312 = tpu.matmul %290, %12, %cst_101 {dimension_numbers = #tpu.dot_dimension_numbers<[1], [0], [0], [1], [0, 0, 1, 1], [], []>} : vector<2x32xf32>, vector<32x128xf32>, vector<2x128xf32> -> vector<2x128xf32>
    %313 = arith.addf %311, %312 : vector<2x128xf32>
    %314 = arith.negf %313 : vector<2x128xf32>
    %315 = math.exp %314 : vector<2x128xf32>
    %cst_102 = arith.constant 1.000000e+00 : f32
    %316 = vector.broadcast %cst_102 : f32 to vector<2x128xf32>
    %317 = arith.addf %316, %315 : vector<2x128xf32>
    %318 = arith.divf %316, %317 : vector<2x128xf32>
    %319 = math.tanh %313 : vector<2x128xf32>
    %320 = vector.extract_strided_slice %318 {offsets = [0, 0], sizes = [2, 32], strides = [1, 1]} : vector<2x128xf32> to vector<2x32xf32>
    %321 = vector.extract_strided_slice %318 {offsets = [0, 32], sizes = [2, 32], strides = [1, 1]} : vector<2x128xf32> to vector<2x32xf32>
    %322 = vector.extract_strided_slice %319 {offsets = [0, 64], sizes = [2, 32], strides = [1, 1]} : vector<2x128xf32> to vector<2x32xf32>
    %323 = vector.extract_strided_slice %318 {offsets = [0, 96], sizes = [2, 32], strides = [1, 1]} : vector<2x128xf32> to vector<2x32xf32>
    %324 = arith.mulf %321, %297 : vector<2x32xf32>
    %325 = arith.mulf %320, %322 : vector<2x32xf32>
    %326 = arith.addf %324, %325 : vector<2x32xf32>
    %327 = math.tanh %326 : vector<2x32xf32>
    %328 = arith.mulf %323, %327 : vector<2x32xf32>
    %329 = arith.index_cast %308 : i32 to index
    %c0_103 = arith.constant 0 : index
    %c0_104 = arith.constant 0 : index
    %330 = vector.load %arg2[%329, %c0_103, %c0_104] : memref<8x2x1xf32, #tpu.memory_space<vmem>>, vector<1x2x1xf32>
    %331 = vector.shape_cast %330 : vector<1x2x1xf32> to vector<2x1xf32>
    %332 = vector.broadcast %331 : vector<2x1xf32> to vector<2x32xf32>
    %333 = arith.mulf %332, %328 : vector<2x32xf32>
    %cst_105 = arith.constant 1.000000e+00 : f32
    %334 = vector.broadcast %cst_105 : f32 to vector<2x1xf32>
    %335 = arith.subf %334, %331 : vector<2x1xf32>
    %336 = vector.broadcast %335 : vector<2x1xf32> to vector<2x32xf32>
    %337 = arith.mulf %336, %290 : vector<2x32xf32>
    %338 = arith.addf %333, %337 : vector<2x32xf32>
    %339 = vector.broadcast %331 : vector<2x1xf32> to vector<2x32xf32>
    %340 = arith.mulf %339, %326 : vector<2x32xf32>
    %cst_106 = arith.constant 1.000000e+00 : f32
    %341 = vector.broadcast %cst_106 : f32 to vector<2x1xf32>
    %342 = arith.subf %341, %331 : vector<2x1xf32>
    %343 = vector.broadcast %342 : vector<2x1xf32> to vector<2x32xf32>
    %344 = arith.mulf %343, %297 : vector<2x32xf32>
    %345 = arith.addf %340, %344 : vector<2x32xf32>
    %346 = vector.broadcast %331 : vector<2x1xf32> to vector<2x32xf32>
    %347 = arith.mulf %346, %328 : vector<2x32xf32>
    %348 = vector.shape_cast %347 : vector<2x32xf32> to vector<1x2x32xf32>
    %c0_107 = arith.constant 0 : index
    %349 = arith.index_cast %308 : i32 to index
    %c0_108 = arith.constant 0 : index
    %c0_109 = arith.constant 0 : index
    %350 = vector.load %arg8[%c0_107, %349, %c0_108, %c0_109] : memref<1x8x2x32xf32, #tpu.memory_space<vmem>>, vector<1x1x2x32xf32>
    %351 = vector.shape_cast %350 : vector<1x1x2x32xf32> to vector<1x2x32xf32>
    %352 = vector.shape_cast %348 : vector<1x2x32xf32> to vector<1x1x2x32xf32>
    tpu.vector_store %arg8[%c0_107, %349, %c0_108, %c0_109], %352 {strides = array<i32>} : memref<1x8x2x32xf32, #tpu.memory_space<vmem>>, vector<1x1x2x32xf32>,
    %c7_i32_110 = arith.constant 7 : i32
    %c2_i32_111 = arith.constant 2 : i32
    %353 = arith.muli %c2_i32_111, %c7_i32_110 : i32
    %c7_i32_112 = arith.constant 7 : i32
    %354 = arith.subi %c7_i32_112, %353 : i32
    %355 = arith.muli %arg0, %354 : i32
    %356 = arith.addi %c7_i32_110, %355 : i32
    %357 = arith.index_cast %356 : i32 to index
    %c0_113 = arith.constant 0 : index
    %c0_114 = arith.constant 0 : index
    %358 = vector.load %arg11[%357, %c0_113, %c0_114] : memref<8x2x128xf32, #tpu.memory_space<vmem>>, vector<1x2x128xf32>
    %359 = vector.shape_cast %358 : vector<1x2x128xf32> to vector<2x128xf32>
    %cst_115 = arith.constant dense<0.000000e+00> : vector<2x128xf32>
    %360 = tpu.matmul %338, %12, %cst_115 {dimension_numbers = #tpu.dot_dimension_numbers<[1], [0], [0], [1], [0, 0, 1, 1], [], []>} : vector<2x32xf32>, vector<32x128xf32>, vector<2x128xf32> -> vector<2x128xf32>
    %361 = arith.addf %359, %360 : vector<2x128xf32>
    %362 = arith.negf %361 : vector<2x128xf32>
    %363 = math.exp %362 : vector<2x128xf32>
    %cst_116 = arith.constant 1.000000e+00 : f32
    %364 = vector.broadcast %cst_116 : f32 to vector<2x128xf32>
    %365 = arith.addf %364, %363 : vector<2x128xf32>
    %366 = arith.divf %364, %365 : vector<2x128xf32>
    %367 = math.tanh %361 : vector<2x128xf32>
    %368 = vector.extract_strided_slice %366 {offsets = [0, 0], sizes = [2, 32], strides = [1, 1]} : vector<2x128xf32> to vector<2x32xf32>
    %369 = vector.extract_strided_slice %366 {offsets = [0, 32], sizes = [2, 32], strides = [1, 1]} : vector<2x128xf32> to vector<2x32xf32>
    %370 = vector.extract_strided_slice %367 {offsets = [0, 64], sizes = [2, 32], strides = [1, 1]} : vector<2x128xf32> to vector<2x32xf32>
    %371 = vector.extract_strided_slice %366 {offsets = [0, 96], sizes = [2, 32], strides = [1, 1]} : vector<2x128xf32> to vector<2x32xf32>
    %372 = arith.mulf %369, %345 : vector<2x32xf32>
    %373 = arith.mulf %368, %370 : vector<2x32xf32>
    %374 = arith.addf %372, %373 : vector<2x32xf32>
    %375 = math.tanh %374 : vector<2x32xf32>
    %376 = arith.mulf %371, %375 : vector<2x32xf32>
    %377 = arith.index_cast %356 : i32 to index
    %c0_117 = arith.constant 0 : index
    %c0_118 = arith.constant 0 : index
    %378 = vector.load %arg2[%377, %c0_117, %c0_118] : memref<8x2x1xf32, #tpu.memory_space<vmem>>, vector<1x2x1xf32>
    %379 = vector.shape_cast %378 : vector<1x2x1xf32> to vector<2x1xf32>
    %380 = vector.broadcast %379 : vector<2x1xf32> to vector<2x32xf32>
    %381 = arith.mulf %380, %376 : vector<2x32xf32>
    %cst_119 = arith.constant 1.000000e+00 : f32
    %382 = vector.broadcast %cst_119 : f32 to vector<2x1xf32>
    %383 = arith.subf %382, %379 : vector<2x1xf32>
    %384 = vector.broadcast %383 : vector<2x1xf32> to vector<2x32xf32>
    %385 = arith.mulf %384, %338 : vector<2x32xf32>
    %386 = arith.addf %381, %385 : vector<2x32xf32>
    %387 = vector.broadcast %379 : vector<2x1xf32> to vector<2x32xf32>
    %388 = arith.mulf %387, %374 : vector<2x32xf32>
    %cst_120 = arith.constant 1.000000e+00 : f32
    %389 = vector.broadcast %cst_120 : f32 to vector<2x1xf32>
    %390 = arith.subf %389, %379 : vector<2x1xf32>
    %391 = vector.broadcast %390 : vector<2x1xf32> to vector<2x32xf32>
    %392 = arith.mulf %391, %345 : vector<2x32xf32>
    %393 = arith.addf %388, %392 : vector<2x32xf32>
    %394 = vector.broadcast %379 : vector<2x1xf32> to vector<2x32xf32>
    %395 = arith.mulf %394, %376 : vector<2x32xf32>
    %396 = vector.shape_cast %395 : vector<2x32xf32> to vector<1x2x32xf32>
    %c0_121 = arith.constant 0 : index
    %397 = arith.index_cast %356 : i32 to index
    %c0_122 = arith.constant 0 : index
    %c0_123 = arith.constant 0 : index
    %398 = vector.load %arg8[%c0_121, %397, %c0_122, %c0_123] : memref<1x8x2x32xf32, #tpu.memory_space<vmem>>, vector<1x1x2x32xf32>
    %399 = vector.shape_cast %398 : vector<1x1x2x32xf32> to vector<1x2x32xf32>
    %400 = vector.shape_cast %396 : vector<1x2x32xf32> to vector<1x1x2x32xf32>
    tpu.vector_store %arg8[%c0_121, %397, %c0_122, %c0_123], %400 {strides = array<i32>} : memref<1x8x2x32xf32, #tpu.memory_space<vmem>>, vector<1x1x2x32xf32>,
    %c8_i32 = arith.constant 8 : i32
    %c0_124 = arith.constant 0 : index
    %c0_125 = arith.constant 0 : index
    %c0_126 = arith.constant 0 : index
    %401 = vector.load %arg9[%c0_124, %c0_125, %c0_126] : memref<1x2x32xf32, #tpu.memory_space<vmem>>, vector<1x2x32xf32>
    %402 = vector.shape_cast %401 : vector<1x2x32xf32> to vector<2x32xf32>
    %403 = vector.shape_cast %386 : vector<2x32xf32> to vector<1x2x32xf32>
    tpu.vector_store %arg9[%c0_124, %c0_125, %c0_126], %403 {strides = array<i32>} : memref<1x2x32xf32, #tpu.memory_space<vmem>>, vector<1x2x32xf32>,
    %c0_127 = arith.constant 0 : index
    %c0_128 = arith.constant 0 : index
    %c0_129 = arith.constant 0 : index
    %404 = vector.load %arg10[%c0_127, %c0_128, %c0_129] : memref<1x2x32xf32, #tpu.memory_space<vmem>>, vector<1x2x32xf32>
    %405 = vector.shape_cast %404 : vector<1x2x32xf32> to vector<2x32xf32>
    %406 = vector.shape_cast %393 : vector<2x32xf32> to vector<1x2x32xf32>
    tpu.vector_store %arg10[%c0_127, %c0_128, %c0_129], %406 {strides = array<i32>} : memref<1x2x32xf32, #tpu.memory_space<vmem>>, vector<1x2x32xf32>,
    return
  }
  func.func @transform_0(%arg0: i32) -> (i32, i32, i32) {
    %c0_i32 = arith.constant 0 : i32
    %c0_i32_0 = arith.constant 0 : i32
    %c0_i32_1 = arith.constant 0 : i32
    %c0_i32_2 = arith.constant 0 : i32
    return %c0_i32, %c0_i32_0, %c0_i32_1 : i32, i32, i32
  }
  func.func @transform_1(%arg0: i32) -> (i32, i32, i32) {
    %c0_i32 = arith.constant 0 : i32
    %c0_i32_0 = arith.constant 0 : i32
    %c0_i32_1 = arith.constant 0 : i32
    %c0_i32_2 = arith.constant 0 : i32
    return %c0_i32, %c0_i32_0, %c0_i32_1 : i32, i32, i32
  }
  func.func @transform_2(%arg0: i32) -> (i32, i32, i32) {
    %c0_i32 = arith.constant 0 : i32
    %c0_i32_0 = arith.constant 0 : i32
    %c0_i32_1 = arith.constant 0 : i32
    return %arg0, %c0_i32, %c0_i32_0 : i32, i32, i32
  }
  func.func @transform_3(%arg0: i32) -> (i32, i32, i32) {
    %c0_i32 = arith.constant 0 : i32
    %c0_i32_0 = arith.constant 0 : i32
    %c0_i32_1 = arith.constant 0 : i32
    return %arg0, %c0_i32, %c0_i32_0 : i32, i32, i32
  }
  func.func @transform_4(%arg0: i32) -> (i32, i32, i32) {
    %c0_i32 = arith.constant 0 : i32
    %c0_i32_0 = arith.constant 0 : i32
    %c0_i32_1 = arith.constant 0 : i32
    return %arg0, %c0_i32, %c0_i32_0 : i32, i32, i32
  }
  func.func @transform_5(%arg0: i32) -> (i32, i32, i32) {
    %c0_i32 = arith.constant 0 : i32
    %c0_i32_0 = arith.constant 0 : i32
    %c0_i32_1 = arith.constant 0 : i32
    return %arg0, %c0_i32, %c0_i32_0 : i32, i32, i32
  }
  func.func @transform_6(%arg0: i32) -> (i32, i32, i32) {
    %c0_i32 = arith.constant 0 : i32
    %c0_i32_0 = arith.constant 0 : i32
    %c0_i32_1 = arith.constant 0 : i32
    return %arg0, %c0_i32, %c0_i32_0 : i32, i32, i32
  }
  func.func @transform_7(%arg0: i32) -> (i32, i32, i32, i32) {
    %c0_i32 = arith.constant 0 : i32
    %c0_i32_0 = arith.constant 0 : i32
    %c0_i32_1 = arith.constant 0 : i32
    %c0_i32_2 = arith.constant 0 : i32
    return %arg0, %c0_i32, %c0_i32_0, %c0_i32_1 : i32, i32, i32, i32
  }
  func.func @transform_8(%arg0: i32) -> (i32, i32, i32) {
    %c0_i32 = arith.constant 0 : i32
    %c0_i32_0 = arith.constant 0 : i32
    %c0_i32_1 = arith.constant 0 : i32
    return %arg0, %c0_i32, %c0_i32_0 : i32, i32, i32
  }
  func.func @transform_9(%arg0: i32) -> (i32, i32, i32) {
    %c0_i32 = arith.constant 0 : i32
    %c0_i32_0 = arith.constant 0 : i32
    %c0_i32_1 = arith.constant 0 : i32
    return %arg0, %c0_i32, %c0_i32_0 : i32, i32, i32
  }
}

</mosaic_0001>

<bundles_post_ra>
// kernel: tpu_custom_call.1
= control target key start
LH: loop header
LB: loop body
LE: loop exit
PB: predicated region body
PF: predicated region fallthrough
CT: control target
= control target key end

     0   :  { %s3302_s0 = inlined_call_operand.vmem [shape: f32[8,2,16], index: 0, kind: input, shape index: {}]   ;;  %s3303_s1 = inlined_call_operand.vmem [shape: f32[8,2,1], index: 1, kind: input, shape index: {}]   ;;  %s3304_s2 = inlined_call_operand.hbm [shape: f32[2,16,128], index: 2, kind: input, shape index: {}]   ;;  %s3305_s3 = inlined_call_operand.hbm [shape: f32[2,32,128], index: 3, kind: input, shape index: {}]   ;;  %s3306_s4 = inlined_call_operand.vmem [shape: f32[2,1,128], index: 4, kind: input, shape index: {}]   ;;  %s3307_s5 = inlined_call_operand.vmem [shape: f32[2,2,32], index: 5, kind: input, shape index: {}]   ;;  %s3308_s6 = inlined_call_operand.vmem [shape: f32[2,2,32], index: 6, kind: input, shape index: {}]   ;;  %s3309_s7 = inlined_call_operand.hbm [shape: f32[2,8,2,32], index: 7, kind: output, shape index: {0}]   ;;  %s3310_s8 = inlined_call_operand.hbm [shape: f32[2,2,32], index: 8, kind: output, shape index: {1}]   ;;  %s3311_s9 = inlined_call_operand.hbm [shape: f32[2,2,32], index: 9, kind: output, shape index: {2}]  }
   0x1   :  { %3321 = sst [smem:[#allocation19_spill]] %s3304_s2 }
   0x2   :  { %15 = vsyncpa [#allocation4], 0 }
   0x3   :  { %17 = vsyncpa [#allocation4 + $0x1], 0 }
   0x4   :  { %18 = vsyncpa [#allocation7], 0 }
   0x5   :  { %20 = vsyncpa [#allocation7 + $0x1], 0 }
   0x6   :  { %21 = vsyncpa [#allocation5], 0 }
   0x7   :  { %23 = vsyncpa [#allocation5 + $0x1], 0 }
   0x8   :  { %24 = vsyncpa [#allocation10], 0 }
   0x9   :  { %26 = vsyncpa [#allocation10 + $0x1], 0  ;;  %s2711_s30 = smov 0   ;;  %s2713_s10 = smov 0  }
   0xa   :  { %s2715_s11 = smov 0   ;;  %s2717_s12 = smov 0  }
   0xb LB: > { %3322 = sst [smem:[#allocation16_spill]] %s2639_s11  ;;  %s2732_s13 = sadd.s32 4294967295, %s2643_s12   ;;  %s2643_s12 = sphi %s2717_s12, %s3342_s12   ;;  %s2639_s11 = sphi %s2715_s11, %s3344_s11   ;;  %s2635_s10 = sphi %s2713_s10, %s3346_s10   ;;  %s2631_s30 = sphi %s2711_s30, %s3345_s30  }
   0xc   : > { %s3312_s14 = sadd.s32 4294967294, %s2643_s12   ;;  %s2736_s15 = sadd.s32 1, %s2643_s12  }
   0xd   : > { %3323 = sst [smem:[#allocation17_spill]] %s2736_s15  ;;  %s81_s16 = sadd.s32 1, %s2639_s11 }
   0xe   : > { %s78_s17 = ssub.s32 %s2643_s12, %s2736_s15  ;;  %p88_p0 = scmp.ne.s32.totalorder %s2639_s11, %s2635_s10 }
   0xf   : > { %p79_p1 = scmp.eq.s32.totalorder %s78_s17, 0  ;;  %p89_p2 = scmp.eq.s32.totalorder %s2643_s12, 0 }
  0x10   : > { %p94_p3 = scmp.ne.s32.totalorder %s2635_s10, %s2631_s30  ;;  %p95_p4 = scmp.eq.s32.totalorder %s2732_s13, 0 }
  0x11   : > { %s2748_s18 = scalar_select %p79_p1, %s2639_s11, %s81_s16  }
  0x12   : > { %p2750_p5 = por %p89_p2, %p88_p0  ;;  %p2754_p6 = por %p95_p4, %p94_p3 }
  0x13   : > { %3324 = sst [smem:[#allocation18_spill]] %s2748_s18  ;;  %p222_p7 = scmp.eq.s32.totalorder %s2732_s13, 1 }
  0x14   : > { %s3326_s20 = scalar_select %p2754_p6, 1, 0 }
  0x15   : > { %p228_p8 = scmp.eq.s32.totalorder %s3312_s14, 1  ;;  %p2342_p10 = scmp.lt.s32.totalorder %s2643_s12, 2 }
  0x16   : > { %p2763_p11 = por %p222_p7, %p88_p0  ;;  %s2772_s23 = sand.u32 1, %s2639_s11  }
  0x17   : > { %p2767_p12 = por %p228_p8, %p94_p3  ;;  %s2121_s24 = sshll.u32 %s2643_s12, 8 }
  0x18   : > { %s3327_s21 = scalar_select %p2763_p11, 1, 0 }
  0x19   : > { %s3328_s22 = scalar_select %p2767_p12, 1, 0 }
  0x1a   : > { %s2037_s25 = sshll.u32 %s2772_s23, 4  ;;  %s3329_s2 = sld [smem:[#allocation19_spill]] }
  0x1b   : > { %s310_s29 = scalar_lea.vmem [#allocation3], %s2037_s25  ;;  %p2783_p13 = pnand %p2342_p10, %p2750_p5 }
  0x1c   : > { %s317_s16 = sshll.u32 %s310_s29, 4  ;;  %s307_s14 = scalar_lea.sflag [#allocation4], %s2772_s23  ;;  %s2787_s16 = int_to_ptr.vmem [resolvable:$true] %s317_s16 }
  0x1d   : > { %p2455_p1 = pneg %p2783_p13 }
  0x20   : > { %s2779_s28 = scalar_lea.hbm %s3329_s2, %s2121_s24  ;;  %s2458_s19 = scalar_lea.hbm %s3329_s2, 512 }
  0x21   : > { %s2453_s18 = scalar_lea.hbm %s2779_s28, 256  ;;  %p2459_p4 = scmp.lt.u32.totalorder %s2779_s28, %s3329_s2 }
  0x22   : > { %p2454_p0 = scmp.ne.s32.totalorder %s2779_s28, %s2453_s18  ;;  %p2460_p5 = scmp.lt.u32.totalorder %s2458_s19, %s2453_s18 }
  0x23   : > { %p2462_p8 = scmp.lt.u32.totalorder %s2453_s18, %s2779_s28 }
  0x24   : > { %p2456_p2 = pnand %p2455_p1, %p2454_p0  ;;  %p2461_p7 = por %p2460_p5, %p2459_p4 }
  0x26   : > { %p2457_p3 = pneg %p2456_p2  ;;  %p2463_p10 = por %p2462_p8, %p2461_p7 }
  0x28   : > { %p2464_p9 = pnand %p2463_p10, %p2457_p3 }
  0x2a   : > { %2467 = shalt.err (!%p2464_p9)
}
  0x2b   : > { %s2468_s29 = scalar_lea.vmem %s2787_s16, 256  ;;  %s2645_s24 = smov [#allocation3]  }
  0x2c   : > { %p2469_p0 = scmp.ne.s32.totalorder %s2787_s16, %s2468_s29  ;;  %s2473_s25 = sshll.u32 %s2645_s24, 4  ;;  %s2474_s25 = int_to_ptr.vmem [resolvable:$false] %s2473_s25 }
  0x2d   : > { %s2475_s26 = scalar_lea.vmem %s2474_s25, 512  ;;  %p2476_p11 = scmp.lt.s32.totalorder %s2787_s16, %s2474_s25 }
  0x2e   : > { %p2471_p2 = pnand %p2469_p0, %p2455_p1  ;;  %p2477_p4 = scmp.lt.s32.totalorder %s2475_s26, %s2468_s29 }
  0x30   : > { %p2472_p12 = pneg %p2471_p2  ;;  %p2478_p5 = por %p2477_p4, %p2476_p11 }
  0x32   : > { %p2479_p7 = pnand %p2478_p5, %p2472_p12 }
  0x34   : > { %2482 = shalt.err (!%p2479_p7)
}
  0x35   : > { %s2646_s18 = smov 128   ;;  %s2647_s19 = smov 8  }
  0x36   : > { %2328 = dma.hbm_to_vmem [thread:$0]  (!%p2783_p13), %s2779_s28, 256, %s2787_s16, %s307_s14, %s2646_s18, %s2646_s18, %s2647_s19  }
  0x37   : > { %p2043_p9 = scmp.ge.s32.totalorder %s2643_s12, 1  ;;  %p366_p11 = scmp.lt.s32.totalorder %s2643_s12, 3 }
  0x38   : > { %s2040_s27 = sshll.u32 %s2772_s23, 5  ;;  %s2122_s24 = sshll.u32 %s2643_s12, 9 }
  0x39   : > { %p2823_p12 = pnand %p2043_p9, %p366_p11  ;;  %s331_s25 = scalar_lea.vmem [#allocation6], %s2040_s27 }
  0x3a   : > { %s338_s26 = sshll.u32 %s331_s25, 4  ;;  %s2831_s15 = scalar_lea.hbm %s3305_s3, %s2122_s24  ;;  %s2833_s26 = int_to_ptr.vmem [resolvable:$true] %s338_s26 }
  0x3b   : > { %s328_s14 = scalar_lea.sflag [#allocation7], %s2772_s23  ;;  %s2483_s28 = scalar_lea.hbm %s2831_s15, 512 }
  0x3c   : > { %p2484_p3 = scmp.ne.s32.totalorder %s2831_s15, %s2483_s28  ;;  %s2488_s25 = scalar_lea.hbm %s3305_s3, 1024 }
  0x3d   : > { %p2489_p0 = scmp.lt.u32.totalorder %s2831_s15, %s3305_s3  ;;  %p2490_p2 = scmp.lt.u32.totalorder %s2488_s25, %s2483_s28 }
  0x3e   : > { %p2486_p8 = pnand %p2484_p3, %p2455_p1  ;;  %p2492_p5 = scmp.lt.u32.totalorder %s2483_s28, %s2831_s15 }
  0x3f   : > { %p2491_p4 = por %p2490_p2, %p2489_p0 }
  0x40   : > { %p2487_p10 = pneg %p2486_p8 }
  0x41   : > { %p2493_p7 = por %p2492_p5, %p2491_p4 }
  0x43   : > { %p2494_p9 = pnand %p2493_p7, %p2487_p10 }
  0x45   : > { %2497 = shalt.err (!%p2494_p9)
}
  0x46   : > { %s2498_s24 = scalar_lea.vmem %s2833_s26, 512  ;;  %s2648_s16 = smov [#allocation6]  }
  0x47   : > { %p2499_p11 = scmp.ne.s32.totalorder %s2833_s26, %s2498_s24  ;;  %s2503_s27 = sshll.u32 %s2648_s16, 4  ;;  %s2504_s27 = int_to_ptr.vmem [resolvable:$false] %s2503_s27 }
  0x48   : > { %s2505_s2 = scalar_lea.vmem %s2504_s27, 1024  ;;  %p2506_p6 = scmp.lt.s32.totalorder %s2833_s26, %s2504_s27 }
  0x49   : > { %p2501_p3 = pnand %p2499_p11, %p2455_p1  ;;  %p2507_p0 = scmp.lt.s32.totalorder %s2505_s2, %s2498_s24 }
  0x4b   : > { %p2502_p8 = pneg %p2501_p3  ;;  %p2508_p2 = por %p2507_p0, %p2506_p6 }
  0x4d   : > { %p2509_p4 = pnand %p2508_p2, %p2502_p8 }
  0x4f   : > { %2512 = shalt.err (!%p2509_p4)
}
  0x50   : > { %2331 = dma.hbm_to_vmem [thread:$0]  (!%p2783_p13), %s2831_s15, 512, %s2833_s26, %s328_s14, %s2646_s18, %s2646_s18, %s2647_s19  }
  0x51   : > { %370 = sbr.rel (%p2823_p12) target bundleno = 5833 (0x16c9), region = 48  ;;  %s2867_s28 = sand.u32 (!%p2823_p12), 1, %s2635_s10  }
  0x52   : > { %s2044_s25 = sshll.u32 (!%p2823_p12), %s2867_s28, 4  ;;  %s373_s17 = scalar_lea.sflag (!%p2823_p12), [#allocation4], %s2867_s28 }
  0x53   : > { %s376_s11 = scalar_lea.vmem (!%p2823_p12), [#allocation3], %s2044_s25  ;;  %p3332_p6 = scmp.ne.s32.totalorder (!%p2823_p12), %s3326_s20, 0 }
  0x58   : > { %2614 = dma.done.wait (%p3332_p6), %s373_s17, 256  }
  0x59   : > { %2616 = vsyncadd (%p3332_p6), %s373_s17, 4294967040  ;;  %s2045_s15 = sshll.u32 %s2867_s28, 5  ;;  %s382_s23 = scalar_lea.sflag [#allocation7], %s2867_s28 }
  0x5a   : > { %s2879_s18 = scalar_lea.vmem [#allocation6], %s2045_s15 }
  0x5b   : > { %2618 = dma.done.wait (%p3332_p6), %s382_s23, 512  }
  0x5c   : > { %2620 = vsyncadd (%p3332_p6), %s382_s23, 4294966784  ;;  %v487_v0 = vlaneseq  ;;  %v2649_v1 = vmov 1983009808   ;;  %v2650_v3 = vmov 0.0|0.0   ;;  %vm2651_vm0 = vmmov 0   ;;  %p446_p13 = scmp.lt.s32.totalorder %s2732_s13, 1 }
  0x5d   : > { %v485_v2 = vunpack.c.l.s4 %v2649_v1  ;;  %2267 = vmatprep.subr.bf16.mxu1 %v2650_v3  ;;  %v2652_v4 = vmov 0.0   ;;  %v465_v7 = vld [vmem:[%s376_s11] sm:$0xff]  ;;  %v466_v8 = vld [vmem:[%s376_s11 + $0x8] sm:$0xff]  ;;  %vm516_vm1 = vcmask 130048   ;;  %vm658_vm2 = vcmask 261120   ;;  %s2966_s15 = smul.u32 14, %s2732_s13 }
  0x5e   : > { %2183 = vmatprep.mubr.msk.f32.mxu1 %vm2651_vm0, %v2652_v4  ;;  %v488_v6 = vshrl.u32 %v487_v0, 7  ;;  %v457_v9 = vld [vmem:[%s3302_s0] sm:$0x3]  ;;  %s2895_s29 = scalar_select %p446_p13, %s2732_s13, 1  ;;  %v2263_v11 = vpack.c.bf16 %v466_v8, %v465_v7  ;;  %v458_v12 = vld [vmem:[%s3302_s0 + $0x2] sm:$0x3] }
  0x5f   : > { %v486_v5 = vunpack.c.0.s8 %v485_v2  ;;  %v459_v13 = vld [vmem:[%s3302_s0 + $0x4] sm:$0x3]  ;;  %v460_v14 = vld [vmem:[%s3302_s0 + $0x6] sm:$0x3]  ;;  %v482_v15 = vcombine.low %v457_v9, %v458_v12  ;;  %v461_v17 = vld [vmem:[%s3302_s0 + $0x8] sm:$0x3] }
  0x60   : > { %v483_v16 = vcombine.low %v459_v13, %v460_v14  ;;  %v462_v18 = vld [vmem:[%s3302_s0 + $0xa] sm:$0x3]  ;;  %v463_v19 = vld [vmem:[%s3302_s0 + $0xc] sm:$0x3]  ;;  %2264 = vmatprep.subr.bf16.mxu0 %v2263_v11  ;;  %v464_v20 = vld [vmem:[%s3302_s0 + $0xe] sm:$0x3]  ;;  %s448_s11 = scalar_lea.vmem %s3306_s4, %s2895_s29 }
  0x61   : > { %v2892_v10 = vsub.s32 %v486_v5, %v488_v6  ;;  %v499_v21 = vcombine.low %v461_v17, %v462_v18  ;;  %v648_v22 = vld [vmem:[%s2879_s18] sm:$0xff]  ;;  %v649_v23 = vld [vmem:[%s2879_s18 + $0x8] sm:$0xff]  ;;  %2266 = vmatpush3.bf16.msra.mxu0 %v2263_v11  ;;  %v500_v26 = vcombine.low %v463_v19, %v464_v20  ;;  %v650_v28 = vld [vmem:[%s2879_s18 + $0x10] sm:$0xff]  ;;  %s2049_s24 = sshll.u32 %s2895_s29, 1  ;;  %v2653_v36 = vmov 0   ;;  %s656_s23 = scalar_lea.vmem [#allocation2], %s2966_s15 }
  0x62   : > { %v2922_v27 = vpack.c.bf16 %v649_v23, %v648_v22  ;;  %v651_v29 = vld [vmem:[%s2879_s18 + $0x18] sm:$0xff]  ;;  %2273 = vmatprep.subr.bf16.mxu0 %v2650_v3  ;;  %s452_s18 = scalar_lea.vmem %s3307_s5, %s2049_s24  ;;  %2388 = vset.pattern.permute.xlu0 %v2653_v36  ;;  %v2051_v37 = vld [vmem:[%s448_s11] ss:$0 sm:$0xff]  ;;  %s456_s26 = scalar_lea.vmem %s3308_s6, %s2049_s24  ;;  %vm793_vm3 = vcmask 254976  }
  0x63   : > { %v490_v24 = vrot.slane %v482_v15, %v2892_v10  ;;  %v497_v25 = vrot.slane %v483_v16, %v2892_v10  ;;  %v507_v30 = vrot.slane %v499_v21, %v2892_v10  ;;  %v514_v32 = vrot.slane %v500_v26, %v2892_v10  ;;  %v2940_v35 = vld [vmem:[%s452_s18] sm:$0x3]  ;;  %2387 = vset.pattern.permute.xlu1 %v2653_v36  ;;  %s2654_s14 = smov 64   ;;  %s761_s18 = scalar_lea.vmem %s3303_s1, %s2966_s15 }
  0x64   : > { %2269 = vmatpush3.bf16.msra.mxu1 %v2922_v27  ;;  %v2931_v33 = vpack.c.bf16 %v651_v29, %v650_v28  ;;  %v653_v57 = vld [vmem:[%s456_s26] sm:$0x3]  ;;  %s3319_s2 = smov 32   ;;  %s3318_s29 = smov 96  }
  0x65   : > { %v498_v31 = vcombine.low %v490_v24, %v497_v25  ;;  %2270 = vmatprep.subr.bf16.mxu1 %v2650_v3  ;;  %v515_v34 = vcombine.low %v507_v30, %v514_v32  ;;  %v762_v58 = vld [vmem:[%s761_s18] sm:$0x3]  ;;  %s2989_s24 = smul.u32 10, %s2732_s13  ;;  %s3041_s17 = sshll.u32 %s2732_s13, 1 }
  0x66   : > { %v769_v1 = vsub.f32 1.0, %v762_v58  ;;  %s3019_s19 = smul.u32 6, %s2732_s13  ;;  %s1891_s11 = scalar_lea.vmem [#allocation2], %s3041_s17 }
  0x67   : > { %2172 = vmatprep.mubr.msk.f32.mxu0 %vm516_vm1, %v498_v31  ;;  %s1868_s20 = scalar_lea.vmem [#allocation2], %s2989_s24  ;;  %s1184_s16 = ssub.s32 4, %s2732_s13 }
  0x68   : > { %2173 = vmatmul.mubr.msk.f32.vlgmr.msra.gmra.mrb[0].mxu0 %vm516_vm1, %v515_v34  ;;  %2272 = vmatpush3.bf16.msra.mxu1 %v2931_v33  ;;  %s1880_s26 = scalar_lea.vmem [#allocation2], %s3019_s19  ;;  %s1884_s18 = scalar_lea.vmem %s3303_s1, %s3019_s19 }
  0x69   : > { %2275 = vmatpush3.bf16.msra.mxu0 %v2922_v27  ;;  %2194 = vmatprep.mubr.msk.f32.mxu0 %vm2651_vm0, %v2652_v4  ;;  %s3062_s27 = sshll.u32 %s1184_s16, 1  ;;  %p3334_p12 = scmp.ne.s32.totalorder %s3327_s21, 0 }
  0x6a   : > { %2276 = vmatprep.subr.bf16.mxu0 %v2650_v3  ;;  %2279 = vmatprep.subr.bf16.mxu1 %v2650_v3 }
  0x6b   : > { %2184 = vmatmul.mubr.msk.f32.vlgmr.msra.gmra.mrb[0].mxu1 %vm658_vm2, %v2940_v35 }
  0x6c   : > { %2281 = vmatpush3.bf16.msra.mxu1 %v2922_v27  ;;  %2205 = vmatprep.mubr.msk.f32.mxu1 %vm2651_vm0, %v2652_v4 }
  0x6d   : > { %2278 = vmatpush3.bf16.msra.mxu0 %v2931_v33  ;;  %2282 = vmatprep.subr.bf16.mxu1 %v2650_v3 }
  0x6e   : > { %2285 = vmatprep.subr.bf16.mxu0 %v2650_v3 }
  0x70   : > { %2284 = vmatpush3.bf16.msra.mxu1 %v2931_v33 }
  0x71   : > { %2291 = vmatprep.subr.bf16.mxu1 %v2650_v3 }
 0x13b   : > { %v2174_v38 = vpop.f32.mrb[0].mxu0 }
 0x13c   : > { %v593_v39 = vadd.f32 %v2174_v38, %v2051_v37  ;;  %v587_v40 = vpop.f32.mrb[1].mxu0 }
 0x13d   : > { %v588_v41 = vadd.f32 %v2051_v37, %v587_v40 }
 0x13e   : > { %v615_v42 = vcombine.high %v593_v39, %v593_v39  ;;  %v622_v43 = vrot.slane %v593_v39, %v2892_v10  ;;  %2056 = vst.sshfl [vmem:[#allocation2 + $0x8] sm:$0x3 pattern:$0x76325410] %v593_v39  ;;  %v728_v44 = vpop.f32.mrb[0].mxu1 }
 0x13f   : > { %v598_v45 = vcombine.high %v588_v41, %v588_v41  ;;  %v605_v46 = vrot.slane %v588_v41, %v2892_v10  ;;  %2054 = vst.sshfl [vmem:[#allocation2] sm:$0x3 pattern:$0x76325410] %v588_v41  ;;  %v2185_v47 = vpop.f32.mrb[1].mxu1 }
 0x140   : > { %v629_v48 = vrot.slane %v615_v42, %v2892_v10  ;;  %v630_v49 = vcombine.high %v622_v43, %v622_v43  ;;  %2057 = vst.sshfl [vmem:[#allocation2 + $0xc] sm:$0x3 pattern:$0x76325410] %v615_v42 }
 0x141   : > { %v612_v50 = vrot.slane %v598_v45, %v2892_v10  ;;  %v613_v51 = vcombine.high %v605_v46, %v605_v46  ;;  %2055 = vst.sshfl [vmem:[#allocation2 + $0x4] sm:$0x3 pattern:$0x76325410] %v598_v45 }
 0x142   : > { %v631_v52 = vcombine.high %v629_v48, %v629_v48  ;;  %645 = vst [vmem:[#allocation2 + $0xa] sm:$0x3] %v630_v49 }
 0x143   : > { %v614_v53 = vcombine.high %v612_v50, %v612_v50  ;;  %641 = vst [vmem:[#allocation2 + $0x2] sm:$0x3] %v613_v51 }
 0x144   : > { %647 = vst [vmem:[#allocation2 + $0xe] sm:$0x3] %v631_v52 }
 0x145   : > { %643 = vst [vmem:[#allocation2 + $0x6] sm:$0x3] %v614_v53 }
 0x14c   : > { %v657_v54 = vld [vmem:[%s656_s23] sm:$0x3]  ;;  %s1872_s23 = scalar_lea.vmem %s3303_s1, %s2989_s24  ;;  %v2062_v20 = vld [vmem:[%s1868_s20 + $0x2] sm:$0x3]  ;;  %v2070_v49 = vld [vmem:[%s1880_s26 + $0x4] sm:$0x3]  ;;  %s1894_s26 = scalar_lea.vmem %s3303_s1, %s3041_s17 }
 0x14d   : > { %v732_v55 = vadd.f32 %v728_v44, %v657_v54  ;;  %v2066_v18 = vld [vmem:[%s1872_s23 + $0x2] sm:$0x3]  ;;  %v2074_v54 = vld [vmem:[%s1884_s18 + $0x4] sm:$0x3]  ;;  %s1186_s18 = scalar_lea.vmem [#allocation2], %s3062_s27  ;;  %s1288_s20 = scalar_lea.vmem %s3303_s1, %s3062_s27 }
 0x14e   : > { %v908_v32 = vsub.f32 1.0, %v2066_v18 }
 0x14f   : > { %2389 = vtanh.f32 %v732_v55  ;;  %v2060_v59 = vmul.f32 -1.442695, %v732_v55 }
 0x151   : > { %2391 = vpow2.f32 %v2060_v59 }
 0x159   : > { %v2390_v56 = vpop.eup %2389 }
 0x15a   : > { %746 = vrot.lane.b32.xlu0 %v2390_v56, %s2654_s14 }
 0x15b   : > { %v2392_v60 = vpop.eup %2391 }
 0x15c   : > { %v736_v61 = vadd.f32 1.0, %v2392_v60 }
 0x15e   : > { %741 = vrot.lane.b32.xlu0 %v653_v57, %s3319_s2  ;;  %2393 = vrcp.f32 %v736_v61  ;;  %v1038_v61 = vsub.f32 1.0, %v2074_v54 }
 0x162   : > { %765 = vperm.xlu0 %2388, %v762_v58  }
 0x168   : > { %v2394_v62 = vpop.eup %2393 }
 0x1cc   : > { %v747_v63 = vpop.permute.xlu0 %746 }
 0x1cd   : > { %v749_v0 = vmul.f32 %v2394_v62, %v747_v63 }
 0x1cf   : > { %751 = vrot.lane.b32.xlu1 %v749_v0, %s3319_s2 }
 0x1d0   : > { %v742_v2 = vpop.permute.xlu0 %741 }
 0x1d1   : > { %v744_v5 = vmul.f32 %v2394_v62, %v742_v2 }
 0x1d3   : > { %772 = vperm.xlu1 %2387, %v769_v1  }
 0x1e1   : > { %v766_v13 = vpop.permute.xlu0 %765 }
 0x241   : > { %v752_v6 = vpop.permute.xlu1 %751 }
 0x242   : > { %v754_v7 = vadd.f32 %v752_v6, %v744_v5 }
 0x244   : > { %2395 = vtanh.f32 %v754_v7 }
 0x24e   : > { %v2396_v8 = vpop.eup %2395 }
 0x24f   : > { %757 = vrot.lane.b32.xlu1 %v2396_v8, %s2654_s14 }
 0x252   : > { %v773_v9 = vpop.permute.xlu1 %772 }
 0x253   : > { %v775_v10 = vmul.f32 %v773_v9, %v2940_v35  ;;  %v782_v17 = vmul.f32 %v773_v9, %v653_v57  ;;  %v781_v35 = vmul.f32 %v766_v13, %v754_v7 }
 0x255   : > { %777 = vrot.lane.b32.xlu1 %v775_v10, %s3318_s29 }
 0x2c1   : > { %v758_v11 = vpop.permute.xlu1 %757 }
 0x2c2   : > { %v760_v12 = vmul.f32 %v2394_v62, %v758_v11 }
 0x2c4   : > { %v2984_v14 = vmul.f32 %v766_v13, %v760_v12 }
 0x2c7   : > { %v778_v15 = vpop.permute.xlu1 %777 }
 0x2c8   : > { %v780_v16 = vadd.f32 %v778_v15, %v2984_v14 }
 0x2ca   : > { %801 = vrot.lane.b32.xlu0 %v780_v16, %s3319_s2 }
 0x2ce   : > { %784 = vrot.lane.b32.xlu0 %v782_v17, %s3319_s2 }
 0x2d2   : > { %904 = vperm.xlu0 %2388, %v2066_v18  }
 0x33c   : > { %v802_v19 = vpop.permute.xlu0 %801 }
 0x33d   : > { %2195 = vmatmul.mubr.msk.f32.vlgmr.msra.gmra.mrb[2].mxu0 %vm658_vm2, %v802_v19 }
 0x33e   : > { %2287 = vmatpush3.bf16.msra.mxu0 %v2922_v27  ;;  %2216 = vmatprep.mubr.msk.f32.mxu0 %vm2651_vm0, %v2652_v4 }
 0x33f   : > { %2288 = vmatprep.subr.bf16.mxu0 %v2650_v3 }
 0x340   : > { %v785_v34 = vpop.permute.xlu0 %784 }
 0x341   : > { %v787_v36 = vadd.f32 %v785_v34, %v781_v35 }
 0x342   : > { %2290 = vmatpush3.bf16.msra.mxu0 %v2931_v33 }
 0x343   : > { %2297 = vmatprep.subr.bf16.mxu0 %v2650_v3 }
 0x351   : > { %v905_v41 = vpop.permute.xlu0 %904 }
 0x410   : > { %v871_v21 = vpop.f32.mrb[2].mxu0 }
 0x411   : > { %v875_v22 = vadd.f32 %v2062_v20, %v871_v21  ;;  %v2196_v23 = vpop.f32.mrb[3].mxu0  ;;  %v2082_v21 = vld [vmem:[%s1894_s26 + $0x6] sm:$0x3]  ;;  %s3083_s26 = smul.u32 4294967290, %s2732_s13 }
 0x413   : > { %2397 = vtanh.f32 %v875_v22  ;;  %v2064_v25 = vmul.f32 -1.442695, %v875_v22  ;;  %s1907_s16 = scalar_lea.vmem [#allocation2], %s3083_s26  ;;  %s1911_s23 = scalar_lea.vmem %s3303_s1, %s3083_s26 }
 0x415   : > { %2399 = vpow2.f32 %v2064_v25 }
 0x41d   : > { %v2398_v24 = vpop.eup %2397 }
 0x41e   : > { %885 = vrot.lane.b32.xlu1 %v2398_v24, %s2654_s14 }
 0x41f   : > { %v2400_v26 = vpop.eup %2399 }
 0x420   : > { %v879_v28 = vadd.f32 1.0, %v2400_v26 }
 0x422   : > { %2401 = vrcp.f32 %v879_v28 }
 0x42c   : > { %v2402_v29 = vpop.eup %2401 }
 0x42d   : > { %v883_v37 = vmul.f32 %v2402_v29, %v787_v36 }
 0x490   : > { %v886_v30 = vpop.permute.xlu1 %885 }
 0x491   : > { %v888_v31 = vmul.f32 %v2402_v29, %v886_v30 }
 0x493   : > { %890 = vrot.lane.b32.xlu1 %v888_v31, %s3319_s2 }
 0x497   : > { %911 = vperm.xlu1 %2387, %v908_v32  }
 0x505   : > { %v891_v38 = vpop.permute.xlu1 %890 }
 0x506   : > { %v893_v39 = vadd.f32 %v891_v38, %v883_v37 }
 0x508   : > { %2403 = vtanh.f32 %v893_v39  ;;  %v916_v63 = vmul.f32 %v905_v41, %v893_v39 }
 0x512   : > { %v2404_v40 = vpop.eup %2403 }
 0x513   : > { %896 = vrot.lane.b32.xlu0 %v2404_v40, %s2654_s14 }
 0x516   : > { %v912_v42 = vpop.permute.xlu1 %911 }
 0x517   : > { %v914_v45 = vmul.f32 %v912_v42, %v780_v16  ;;  %v917_v62 = vmul.f32 %v912_v42, %v787_v36  ;;  %v2078_v16 = vld [vmem:[%s1891_s11 + $0x6] sm:$0x3] }
 0x519   : > { %v918_v0 = vadd.f32 %v917_v62, %v916_v63 }
 0x585   : > { %v897_v43 = vpop.permute.xlu0 %896 }
 0x586   : > { %v899_v44 = vmul.f32 %v2402_v29, %v897_v43  ;;  %v1167_v29 = vsub.f32 1.0, %v2082_v21 }
 0x588   : > { %v3007_v46 = vmul.f32 %v905_v41, %v899_v44 }
 0x58a   : > { %v915_v47 = vadd.f32 %v914_v45, %v3007_v46 }
 0x58c   : > { %931 = vrot.lane.b32.xlu1 %v915_v47, %s3319_s2 }
 0x5fe   : > { %v932_v48 = vpop.permute.xlu1 %931 }
 0x5ff   : > { %2206 = vmatmul.mubr.msk.f32.vlgmr.msra.gmra.mrb[2].mxu1 %vm658_vm2, %v932_v48 }
 0x600   : > { %2293 = vmatpush3.bf16.msra.mxu1 %v2922_v27  ;;  %2227 = vmatprep.mubr.msk.f32.mxu1 %vm2651_vm0, %v2652_v4 }
 0x601   : > { %2294 = vmatprep.subr.bf16.mxu1 %v2650_v3 }
 0x604   : > { %2296 = vmatpush3.bf16.msra.mxu1 %v2931_v33 }
 0x605   : > { %2303 = vmatprep.subr.bf16.mxu1 %v2650_v3 }
 0x6d2   : > { %v1001_v50 = vpop.f32.mrb[2].mxu1 }
 0x6d3   : > { %v1005_v51 = vadd.f32 %v2070_v49, %v1001_v50  ;;  %v2207_v52 = vpop.f32.mrb[3].mxu1 }
 0x6d4   : > { %v1289_v52 = vld [vmem:[%s1288_s20] sm:$0x3]  ;;  %s3099_s20 = smul.u32 4294967286, %s2732_s13 }
 0x6d5   : > { %2405 = vtanh.f32 %v1005_v51  ;;  %v2072_v55 = vmul.f32 -1.442695, %v1005_v51 }
 0x6d7   : > { %2407 = vpow2.f32 %v2072_v55 }
 0x6df   : > { %v2406_v53 = vpop.eup %2405 }
 0x6e0   : > { %1015 = vrot.lane.b32.xlu0 %v2406_v53, %s2654_s14 }
 0x6e1   : > { %v2408_v56 = vpop.eup %2407 }
 0x6e2   : > { %v1009_v57 = vadd.f32 1.0, %v2408_v56 }
 0x6e4   : > { %1034 = vperm.xlu0 %2388, %v2074_v54   ;;  %2409 = vrcp.f32 %v1009_v57 }
 0x6ee   : > { %v2410_v58 = vpop.eup %2409 }
 0x6ef   : > { %v1013_v1 = vmul.f32 %v2410_v58, %v918_v0 }
 0x752   : > { %v1016_v59 = vpop.permute.xlu0 %1015 }
 0x753   : > { %v1018_v60 = vmul.f32 %v2410_v58, %v1016_v59  ;;  %v1296_v59 = vsub.f32 1.0, %v1289_v52 }
 0x755   : > { %1020 = vrot.lane.b32.xlu1 %v1018_v60, %s3319_s2 }
 0x759   : > { %1041 = vperm.xlu1 %2387, %v1038_v61  }
 0x763   : > { %v1035_v7 = vpop.permute.xlu0 %1034 }
 0x7c7   : > { %v1021_v2 = vpop.permute.xlu1 %1020 }
 0x7c8   : > { %v1023_v5 = vadd.f32 %v1021_v2, %v1013_v1 }
 0x7ca   : > { %2411 = vtanh.f32 %v1023_v5  ;;  %v1046_v31 = vmul.f32 %v1035_v7, %v1023_v5 }
 0x7d4   : > { %v2412_v6 = vpop.eup %2411 }
 0x7d5   : > { %1026 = vrot.lane.b32.xlu0 %v2412_v6, %s2654_s14 }
 0x7d8   : > { %v1042_v8 = vpop.permute.xlu1 %1041 }
 0x7d9   : > { %v1044_v11 = vmul.f32 %v1042_v8, %v915_v47  ;;  %v1047_v30 = vmul.f32 %v1042_v8, %v918_v0  ;;  %v1187_v47 = vld [vmem:[%s1186_s18] sm:$0x3] }
 0x7db   : > { %v1048_v32 = vadd.f32 %v1047_v30, %v1046_v31 }
 0x847   : > { %v1027_v9 = vpop.permute.xlu0 %1026 }
 0x848   : > { %v1029_v10 = vmul.f32 %v2410_v58, %v1027_v9 }
 0x84a   : > { %v3029_v12 = vmul.f32 %v1035_v7, %v1029_v10 }
 0x84c   : > { %v1045_v13 = vadd.f32 %v1044_v11, %v3029_v12 }
 0x84e   : > { %1060 = vrot.lane.b32.xlu1 %v1045_v13, %s3319_s2 }
 0x8c0   : > { %v1061_v15 = vpop.permute.xlu1 %1060 }
 0x8c1   : > { %2217 = vmatmul.mubr.msk.f32.vlgmr.msra.gmra.mrb[4].mxu0 %vm658_vm2, %v1061_v15  ;;  %v2089_v15 = vld [vmem:[%s1907_s16 + $0xa] sm:$0x3]  ;;  %s1919_s16 = scalar_lea.vmem [#allocation2], %s3099_s20 }
 0x8c2   : > { %2299 = vmatpush3.bf16.msra.mxu0 %v2922_v27  ;;  %2238 = vmatprep.mubr.msk.f32.mxu0 %vm2651_vm0, %v2652_v4 }
 0x8c3   : > { %2300 = vmatprep.subr.bf16.mxu0 %v2650_v3 }
 0x8c6   : > { %2302 = vmatpush3.bf16.msra.mxu0 %v2931_v33 }
 0x8c7   : > { %2309 = vmatprep.subr.bf16.mxu0 %v2650_v3 }
 0x994   : > { %v1130_v17 = vpop.f32.mrb[4].mxu0 }
 0x995   : > { %v1134_v18 = vadd.f32 %v2078_v16, %v1130_v17  ;;  %v2218_v19 = vpop.f32.mrb[5].mxu0 }
 0x997   : > { %2413 = vtanh.f32 %v1134_v18  ;;  %v2080_v22 = vmul.f32 -1.442695, %v1134_v18 }
 0x999   : > { %2415 = vpow2.f32 %v2080_v22 }
 0x9a1   : > { %v2414_v20 = vpop.eup %2413 }
 0x9a2   : > { %1144 = vrot.lane.b32.xlu0 %v2414_v20, %s2654_s14 }
 0x9a3   : > { %v2416_v23 = vpop.eup %2415 }
 0x9a4   : > { %v1138_v24 = vadd.f32 1.0, %v2416_v23 }
 0x9a6   : > { %1163 = vperm.xlu0 %2388, %v2082_v21   ;;  %2417 = vrcp.f32 %v1138_v24 }
 0x9b0   : > { %v2418_v25 = vpop.eup %2417 }
 0x9b1   : > { %v1142_v34 = vmul.f32 %v2418_v25, %v1048_v32 }
 0xa14   : > { %v1145_v26 = vpop.permute.xlu0 %1144 }
 0xa15   : > { %v1147_v28 = vmul.f32 %v2418_v25, %v1145_v26 }
 0xa17   : > { %1149 = vrot.lane.b32.xlu1 %v1147_v28, %s3319_s2 }
 0xa1b   : > { %1170 = vperm.xlu1 %2387, %v1167_v29  }
 0xa25   : > { %v1164_v38 = vpop.permute.xlu0 %1163 }
 0xa89   : > { %v1150_v35 = vpop.permute.xlu1 %1149 }
 0xa8a   : > { %v1152_v36 = vadd.f32 %v1150_v35, %v1142_v34 }
 0xa8c   : > { %2419 = vtanh.f32 %v1152_v36  ;;  %v1175_v61 = vmul.f32 %v1164_v38, %v1152_v36 }
 0xa96   : > { %v2420_v37 = vpop.eup %2419 }
 0xa97   : > { %1155 = vrot.lane.b32.xlu0 %v2420_v37, %s2654_s14 }
 0xa9a   : > { %v1171_v39 = vpop.permute.xlu1 %1170 }
 0xa9b   : > { %v1173_v42 = vmul.f32 %v1171_v39, %v1045_v13  ;;  %v1176_v60 = vmul.f32 %v1171_v39, %v1048_v32 }
 0xa9d   : > { %v1177_v62 = vadd.f32 %v1176_v60, %v1175_v61 }
 0xb09   : > { %v1156_v40 = vpop.permute.xlu0 %1155 }
 0xb0a   : > { %v1158_v41 = vmul.f32 %v2418_v25, %v1156_v40 }
 0xb0c   : > { %v3051_v43 = vmul.f32 %v1164_v38, %v1158_v41  ;;  %v2097_v41 = vld [vmem:[%s1919_s16 + $0xc] sm:$0x3]  ;;  %s3112_s16 = smul.u32 4294967282, %s2732_s13 }
 0xb0e   : > { %v1174_v44 = vadd.f32 %v1173_v42, %v3051_v43  ;;  %s1931_s18 = scalar_lea.vmem [#allocation2], %s3112_s16  ;;  %s1935_s29 = scalar_lea.vmem %s3303_s1, %s3112_s16 }
 0xb10   : > { %1189 = vrot.lane.b32.xlu1 %v1174_v44, %s3319_s2 }
 0xb82   : > { %v1190_v45 = vpop.permute.xlu1 %1189 }
 0xb83   : > { %2228 = vmatmul.mubr.msk.f32.vlgmr.msra.gmra.mrb[4].mxu1 %vm658_vm2, %v1190_v45 }
 0xb84   : > { %2305 = vmatpush3.bf16.msra.mxu1 %v2922_v27  ;;  %2249 = vmatprep.mubr.msk.f32.mxu1 %vm2651_vm0, %v2652_v4 }
 0xb85   : > { %2306 = vmatprep.subr.bf16.mxu1 %v2650_v3 }
 0xb88   : > { %2308 = vmatpush3.bf16.msra.mxu1 %v2931_v33 }
 0xc56   : > { %v1259_v48 = vpop.f32.mrb[4].mxu1 }
 0xc57   : > { %v1263_v49 = vadd.f32 %v1259_v48, %v1187_v47  ;;  %v2229_v50 = vpop.f32.mrb[5].mxu1 }
 0xc59   : > { %2421 = vtanh.f32 %v1263_v49  ;;  %v2087_v53 = vmul.f32 -1.442695, %v1263_v49 }
 0xc5b   : > { %2423 = vpow2.f32 %v2087_v53 }
 0xc63   : > { %v2422_v51 = vpop.eup %2421 }
 0xc64   : > { %1273 = vrot.lane.b32.xlu0 %v2422_v51, %s2654_s14 }
 0xc65   : > { %v2424_v54 = vpop.eup %2423 }
 0xc66   : > { %v1267_v55 = vadd.f32 1.0, %v2424_v54 }
 0xc68   : > { %1292 = vperm.xlu0 %2388, %v1289_v52   ;;  %2425 = vrcp.f32 %v1267_v55 }
 0xc72   : > { %v2426_v56 = vpop.eup %2425 }
 0xc73   : > { %v1271_v63 = vmul.f32 %v2426_v56, %v1177_v62 }
 0xcd6   : > { %v1274_v57 = vpop.permute.xlu0 %1273 }
 0xcd7   : > { %v1276_v58 = vmul.f32 %v2426_v56, %v1274_v57 }
 0xcd9   : > { %1278 = vrot.lane.b32.xlu1 %v1276_v58, %s3319_s2 }
 0xcdd   : > { %1299 = vperm.xlu1 %2387, %v1296_v59  }
 0xce7   : > { %v1293_v5 = vpop.permute.xlu0 %1292 }
 0xd4b   : > { %v1279_v0 = vpop.permute.xlu1 %1278 }
 0xd4c   : > { %v1281_v1 = vadd.f32 %v1279_v0, %v1271_v63 }
 0xd4e   : > { %2427 = vtanh.f32 %v1281_v1  ;;  %v1304_v25 = vmul.f32 %v1293_v5, %v1281_v1 }
 0xd58   : > { %v2428_v2 = vpop.eup %2427 }
 0xd59   : > { %1284 = vrot.lane.b32.xlu0 %v2428_v2, %s2654_s14 }
 0xd5c   : > { %v1300_v6 = vpop.permute.xlu1 %1299 }
 0xd5d   : > { %v1302_v9 = vmul.f32 %v1300_v6, %v1174_v44  ;;  %v1305_v24 = vmul.f32 %v1300_v6, %v1177_v62 }
 0xd5f   : > { %v1306_v26 = vadd.f32 %v1305_v24, %v1304_v25 }
 0xdcb   : > { %v1285_v7 = vpop.permute.xlu0 %1284 }
 0xdcc   : > { %v1287_v8 = vmul.f32 %v2426_v56, %v1285_v7 }
 0xdce   : > { %v3072_v10 = vmul.f32 %v1293_v5, %v1287_v8 }
 0xdd0   : > { %v1303_v11 = vadd.f32 %v1302_v9, %v3072_v10  ;;  %v2105_v9 = vld [vmem:[%s1931_s18 + $0xe] sm:$0x3] }
 0xdd2   : > { %1319 = vrot.lane.b32.xlu1 %v1303_v11, %s3319_s2 }
 0xe44   : > { %v1320_v13 = vpop.permute.xlu1 %1319 }
 0xe45   : > { %2239 = vmatmul.mubr.msk.f32.vlgmr.msra.gmra.mrb[6].mxu0 %vm658_vm2, %v1320_v13 }
 0xe46   : > { %2311 = vmatpush3.bf16.msra.mxu0 %v2922_v27  ;;  %2260 = vmatprep.mubr.msk.f32.mxu0 %vm2651_vm0, %v2652_v4 }
 0xe47   : > { %2312 = vmatprep.subr.bf16.mxu0 %v2650_v3  ;;  %v2093_v3 = vld [vmem:[%s1911_s23 + $0xa] sm:$0x3]  ;;  %s1923_s23 = scalar_lea.vmem %s3303_s1, %s3099_s20 }
 0xe48   : > { %v1426_v23 = vsub.f32 1.0, %v2093_v3  ;;  %v2101_v48 = vld [vmem:[%s1923_s23 + $0xc] sm:$0x3]  ;;  %s3333_s23 = smov 96  }
 0xe49   : > { %v1556_v55 = vsub.f32 1.0, %v2101_v48 }
 0xe4a   : > { %2314 = vmatpush3.bf16.msra.mxu0 %v2931_v33 }
 0xf18   : > { %v1389_v16 = vpop.f32.mrb[6].mxu0 }
 0xf19   : > { %v1393_v17 = vadd.f32 %v2089_v15, %v1389_v16  ;;  %v2240_v18 = vpop.f32.mrb[7].mxu0 }
 0xf1b   : > { %2429 = vtanh.f32 %v1393_v17  ;;  %v2091_v4 = vmul.f32 -1.442695, %v1393_v17  ;;  %v2109_v17 = vld [vmem:[%s1935_s29 + $0xe] sm:$0x3]  ;;  %s3133_s29 = scalar_lea.vmem [#allocation8], %s2044_s25 }
 0xf1c   : > { %s792_s18 = scalar_lea.vmem %s3133_s29, %s2966_s15 [#allocation8]  ;;  %s1876_s25 = scalar_lea.vmem %s3133_s29, %s2989_s24 [#allocation8] }
 0xf1d   : > { %2431 = vpow2.f32 %v2091_v4  ;;  %s1888_s15 = scalar_lea.vmem %s3133_s29, %s3019_s19 [#allocation8]  ;;  %s1311_s11 = scalar_lea.vmem %s3133_s29, %s3062_s27 [#allocation8] }
 0xf1e   : > { %s1915_s24 = scalar_lea.vmem %s3133_s29, %s3083_s26 [#allocation8]  ;;  %s1927_s19 = scalar_lea.vmem %s3133_s29, %s3099_s20 [#allocation8] }
 0xf1f   : > { %s1939_s27 = scalar_lea.vmem %s3133_s29, %s3112_s16 [#allocation8]  ;;  %s3320_s26 = sshll.u32 %s2732_s13, 5 }
 0xf25   : > { %v2430_v27 = vpop.eup %2429 }
 0xf26   : > { %1403 = vrot.lane.b32.xlu0 %v2430_v27, %s2654_s14 }
 0xf27   : > { %v2432_v33 = vpop.eup %2431 }
 0xf28   : > { %v1397_v19 = vadd.f32 1.0, %v2432_v33 }
 0xf2a   : > { %1422 = vperm.xlu0 %2388, %v2093_v3   ;;  %2433 = vrcp.f32 %v1397_v19 }
 0xf34   : > { %v2434_v20 = vpop.eup %2433 }
 0xf35   : > { %v1401_v28 = vmul.f32 %v2434_v20, %v1306_v26 }
 0xf98   : > { %v1404_v21 = vpop.permute.xlu0 %1403 }
 0xf99   : > { %v1406_v22 = vmul.f32 %v2434_v20, %v1404_v21 }
 0xf9b   : > { %1408 = vrot.lane.b32.xlu1 %v1406_v22, %s3319_s2 }
 0xf9f   : > { %1429 = vperm.xlu1 %2387, %v1426_v23  }
 0xfa9   : > { %v1423_v32 = vpop.permute.xlu0 %1422 }
0x100d   : > { %v1409_v29 = vpop.permute.xlu1 %1408 }
0x100e   : > { %v1411_v30 = vadd.f32 %v1409_v29, %v1401_v28 }
0x1010   : > { %2435 = vtanh.f32 %v1411_v30  ;;  %v1434_v57 = vmul.f32 %v1423_v32, %v1411_v30 }
0x101a   : > { %v2436_v31 = vpop.eup %2435 }
0x101b   : > { %1414 = vrot.lane.b32.xlu0 %v2436_v31, %s2654_s14 }
0x101e   : > { %v1430_v34 = vpop.permute.xlu1 %1429 }
0x101f   : > { %v1432_v37 = vmul.f32 %v1430_v34, %v1303_v11  ;;  %v1435_v56 = vmul.f32 %v1430_v34, %v1306_v26 }
0x1021   : > { %v1436_v58 = vadd.f32 %v1435_v56, %v1434_v57 }
0x108d   : > { %v1415_v35 = vpop.permute.xlu0 %1414 }
0x108e   : > { %v1417_v36 = vmul.f32 %v2434_v20, %v1415_v35  ;;  %v1686_v20 = vsub.f32 1.0, %v2109_v17 }
0x1090   : > { %v3093_v38 = vmul.f32 %v1423_v32, %v1417_v36 }
0x1092   : > { %v1433_v39 = vadd.f32 %v1432_v37, %v3093_v38 }
0x1094   : > { %1449 = vrot.lane.b32.xlu1 %v1433_v39, %s3319_s2 }
0x1106   : > { %v1450_v40 = vpop.permute.xlu1 %1449 }
0x1107   : > { %2250 = vmatmul.mubr.msk.f32.vlgmr.msra.gmra.mrb[6].mxu1 %vm658_vm2, %v1450_v40 }
0x11da   : > { %v1519_v42 = vpop.f32.mrb[6].mxu1 }
0x11db   : > { %v1523_v44 = vadd.f32 %v2097_v41, %v1519_v42  ;;  %v2251_v45 = vpop.f32.mrb[7].mxu1 }
0x11dd   : > { %2437 = vtanh.f32 %v1523_v44  ;;  %v2099_v49 = vmul.f32 -1.442695, %v1523_v44 }
0x11df   : > { %2439 = vpow2.f32 %v2099_v49 }
0x11e7   : > { %v2438_v47 = vpop.eup %2437 }
0x11e8   : > { %1533 = vrot.lane.b32.xlu0 %v2438_v47, %s2654_s14 }
0x11e9   : > { %v2440_v50 = vpop.eup %2439 }
0x11ea   : > { %v1527_v51 = vadd.f32 1.0, %v2440_v50 }
0x11ec   : > { %1552 = vperm.xlu0 %2388, %v2101_v48   ;;  %2441 = vrcp.f32 %v1527_v51 }
0x11f6   : > { %v2442_v52 = vpop.eup %2441 }
0x11f7   : > { %v1531_v59 = vmul.f32 %v2442_v52, %v1436_v58 }
0x125a   : > { %v1534_v53 = vpop.permute.xlu0 %1533 }
0x125b   : > { %v1536_v54 = vmul.f32 %v2442_v52, %v1534_v53 }
0x125d   : > { %1538 = vrot.lane.b32.xlu1 %v1536_v54, %s3319_s2 }
0x1261   : > { %1559 = vperm.xlu1 %2387, %v1556_v55  }
0x126b   : > { %v1553_v63 = vpop.permute.xlu0 %1552 }
0x12cf   : > { %v1539_v60 = vpop.permute.xlu1 %1538 }
0x12d0   : > { %v1541_v61 = vadd.f32 %v1539_v60, %v1531_v59 }
0x12d2   : > { %2443 = vtanh.f32 %v1541_v61  ;;  %v1564_v22 = vmul.f32 %v1553_v63, %v1541_v61 }
0x12dc   : > { %v2444_v62 = vpop.eup %2443 }
0x12dd   : > { %1544 = vrot.lane.b32.xlu0 %v2444_v62, %s2654_s14 }
0x12e0   : > { %v1560_v0 = vpop.permute.xlu1 %1559 }
0x12e1   : > { %v1562_v5 = vmul.f32 %v1560_v0, %v1433_v39  ;;  %v1565_v21 = vmul.f32 %v1560_v0, %v1436_v58 }
0x12e3   : > { %v1566_v23 = vadd.f32 %v1565_v21, %v1564_v22 }
0x134f   : > { %v1545_v1 = vpop.permute.xlu0 %1544 }
0x1350   : > { %v1547_v2 = vmul.f32 %v2442_v52, %v1545_v1 }
0x1352   : > { %v1555_v6 = vmul.f32 %v1553_v63, %v1547_v2 }
0x1354   : > { %v1563_v7 = vadd.f32 %v1562_v5, %v1555_v6 }
0x1356   : > { %1579 = vrot.lane.b32.xlu1 %v1563_v7, %s3319_s2 }
0x13c8   : > { %v1580_v8 = vpop.permute.xlu1 %1579 }
0x13c9   : > { %2261 = vmatmul.mubr.msk.f32.vlgmr.msra.gmra.mrb[8].mxu0 %vm658_vm2, %v1580_v8 }
0x149c   : > { %v1649_v11 = vpop.f32.mrb[8].mxu0 }
0x149d   : > { %v1653_v13 = vadd.f32 %v2105_v9, %v1649_v11  ;;  %v2262_v15 = vpop.f32.mrb[9].mxu0 }
0x149f   : > { %2445 = vtanh.f32 %v1653_v13  ;;  %v2107_v18 = vmul.f32 -1.442695, %v1653_v13 }
0x14a1   : > { %2447 = vpow2.f32 %v2107_v18 }
0x14a9   : > { %v2446_v16 = vpop.eup %2445 }
0x14aa   : > { %1663 = vrot.lane.b32.xlu0 %v2446_v16, %s2654_s14 }
0x14ab   : > { %v2448_v27 = vpop.eup %2447 }
0x14ac   : > { %v1657_v3 = vadd.f32 1.0, %v2448_v27 }
0x14ae   : > { %1682 = vperm.xlu0 %2388, %v2109_v17   ;;  %2449 = vrcp.f32 %v1657_v3 }
0x14b8   : > { %v2450_v4 = vpop.eup %2449 }
0x14b9   : > { %v1661_v24 = vmul.f32 %v2450_v4, %v1566_v23 }
0x151c   : > { %v1664_v33 = vpop.permute.xlu0 %1663 }
0x151d   : > { %v1666_v19 = vmul.f32 %v2450_v4, %v1664_v33 }
0x151f   : > { %1668 = vrot.lane.b32.xlu1 %v1666_v19, %s3319_s2 }
0x1523   : > { %1689 = vperm.xlu1 %2387, %v1686_v20  }
0x1527   : > { %789 = vrot.lane.b32.xlu1 %v2984_v14, %s3319_s2 }
0x152b   : > { %1050 = vrot.lane.b32.xlu1 %v3029_v12, %s3319_s2 }
0x152d   : > { %v1683_v14 = vpop.permute.xlu0 %1682 }
0x152f   : > { %1308 = vrot.lane.b32.xlu1 %v3072_v10, %s3319_s2 }
0x1533   : > { %1568 = vrot.lane.b32.xlu1 %v1555_v6, %s3319_s2 }
0x1591   : > { %v1669_v25 = vpop.permute.xlu1 %1668 }
0x1592   : > { %v1671_v26 = vadd.f32 %v1669_v25, %v1661_v24 }
0x1594   : > { %2451 = vtanh.f32 %v1671_v26  ;;  %v1694_v29 = vmul.f32 %v1683_v14, %v1671_v26 }
0x159e   : > { %v2452_v28 = vpop.eup %2451 }
0x159f   : > { %1674 = vrot.lane.b32.xlu0 %v2452_v28, %s2654_s14  ;;  %s1897_s14 = scalar_lea.vmem %s3133_s29, %s3041_s17 [#allocation8]  ;;  %s2047_s17 = sshll.u32 %s2867_s28, 1 }
0x15a0   : > { %s3180_s16 = scalar_lea.vmem [#allocation11], %s2047_s17 }
0x15a2   : > { %v1690_v12 = vpop.permute.xlu1 %1689 }
0x15a3   : > { %v1695_v30 = vmul.f32 %v1690_v12, %v1566_v23  ;;  %920 = vrot.lane.b32.xlu0 %v3007_v46, %s3319_s2  ;;  %v1692_v35 = vmul.f32 %v1690_v12, %v1563_v7 }
0x15a5   : > { %v1696_v10 = vadd.f32 %v1695_v30, %v1694_v29 }
0x15a6   : > { %v790_v31 = vpop.permute.xlu1 %789 }
0x15a7   : > { %794 = vst.msk [vmem:[%s792_s18] sm:$0x3] %vm793_vm3, %v790_v31  ;;  %1179 = vrot.lane.b32.xlu0 %v3051_v43, %s3319_s2  ;;  %s2123_s18 = sshll.u32 %s2732_s13, 8 }
0x15aa   : > { %v1051_v32 = vpop.permute.xlu1 %1050 }
0x15ab   : > { %1438 = vrot.lane.b32.xlu0 %v3093_v38, %s3319_s2 }
0x15ae   : > { %v1309_v38 = vpop.permute.xlu1 %1308 }
0x15b2   : > { %v1569_v41 = vpop.permute.xlu1 %1568 }
0x1611   : > { %v1675_v46 = vpop.permute.xlu0 %1674 }
0x1612   : > { %v1677_v34 = vmul.f32 %v2450_v4, %v1675_v46 }
0x1614   : > { %v1685_v36 = vmul.f32 %v1683_v14, %v1677_v34 }
0x1615   : > { %v921_v37 = vpop.permute.xlu0 %920 }
0x1616   : > { %2068 = vst.msk [vmem:[%s1876_s25 + $0x2] sm:$0x3] %vm793_vm3, %v921_v37  ;;  %1698 = vrot.lane.b32.xlu1 %v1685_v36, %s3319_s2  ;;  %v1693_v43 = vadd.f32 %v1692_v35, %v1685_v36  ;;  %s3189_s25 = scalar_lea.hbm %s3310_s8, %s3320_s26 }
0x1617   : > { %2076 = vst.msk [vmem:[%s1888_s15 + $0x4] sm:$0x3] %vm793_vm3, %v1051_v32  ;;  %s1737_s15 = sshll.u32 %s3133_s29, 4  ;;  %s3178_s15 = int_to_ptr.vmem [resolvable:$true] %s1737_s15 }
0x1618   : > { %1704 = vrot.lane.b32.xlu0 %v1693_v43, %s3319_s2  ;;  %s3176_s2 = scalar_lea.hbm %s3309_s7, %s2123_s18  ;;  %s1714_s18 = scalar_lea.sflag [#allocation5], %s2867_s28 }
0x1619   : > { %v1180_v39 = vpop.permute.xlu0 %1179 }
0x161a   : > { %2084 = vst.msk [vmem:[%s1897_s14 + $0x6] sm:$0x3] %vm793_vm3, %v1180_v39  ;;  %s3170_s14 = scalar_lea.vmem [#allocation9], %s2047_s17  ;;  %s2657_s17 = smov [#allocation8]  }
0x161b   : > { %1312 = vst.msk [vmem:[%s1311_s11] sm:$0x3] %vm793_vm3, %v1309_v38  ;;  %s1753_s20 = sshll.u32 %s3170_s14, 4  ;;  %s2513_s11 = scalar_lea.vmem %s3178_s15, 256  ;;  %s3191_s20 = int_to_ptr.vmem [resolvable:$true] %s1753_s20 }
0x161c   : > { %1709 = vrot.lane.b32.xlu0 %v1696_v10, %s3333_s23  ;;  %p2514_p1 = scmp.ne.s32.totalorder %s3178_s15, %s2513_s11  ;;  %s2517_s23 = sshll.u32 %s2657_s17, 4  ;;  %s2518_s23 = int_to_ptr.vmem [resolvable:$false] %s2517_s23 }
0x161d   : > { %v1439_v40 = vpop.permute.xlu0 %1438  ;;  %s2519_s29 = scalar_lea.vmem %s2518_s23, 512  ;;  %p2520_p7 = scmp.lt.s32.totalorder %s3178_s15, %s2518_s23 }
0x161e   : > { %2095 = vst.msk [vmem:[%s1915_s24 + $0xa] sm:$0x3] %vm793_vm3, %v1439_v40  ;;  %p2515_p10 = pnand %p2514_p1, %p3334_p12  ;;  %p2521_p9 = scmp.lt.s32.totalorder %s2519_s29, %s2513_s11 }
0x161f   : > { %2103 = vst.msk [vmem:[%s1927_s19 + $0xc] sm:$0x3] %vm793_vm3, %v1569_v41 }
0x1620   : > { %p2516_p5 = pneg %p2515_p10  ;;  %p2522_p11 = por %p2521_p9, %p2520_p7 }
0x1622   : > { %p2523_p3 = pnand %p2522_p11, %p2516_p5 }
0x1688   : > { %v1699_v42 = vpop.permute.xlu1 %1698 }
0x1689   : > { %2111 = vst.msk [vmem:[%s1939_s27 + $0xe] sm:$0x3] %vm793_vm3, %v1699_v42 }
0x168a   : > { %v1705_v44 = vpop.permute.xlu0 %1704 }
0x168b   : > { %2526 = shalt.err (!%p2523_p3)
}
0x168c   : > { %s2527_s27 = scalar_lea.hbm %s3176_s2, 256  ;;  %s2531_s17 = scalar_lea.hbm %s3309_s7, 512 }
0x168d   : > { %p2528_p8 = scmp.ne.s32.totalorder %s3176_s2, %s2527_s27  ;;  %p2532_p4 = scmp.lt.u32.totalorder %s3176_s2, %s3309_s7 }
0x168e   : > { %p2533_p6 = scmp.lt.u32.totalorder %s2531_s17, %s2527_s27  ;;  %p2535_p1 = scmp.lt.u32.totalorder %s2527_s27, %s3176_s2 }
0x168f   : > { %p2529_p0 = pnand %p2528_p8, %p3334_p12 }
0x1690   : > { %p2534_p13 = por %p2533_p6, %p2532_p4 }
0x1691   : > { %p2530_p2 = pneg %p2529_p0 }
0x1692   : > { %p2536_p10 = por %p2535_p1, %p2534_p13 }
0x1694   : > { %p2537_p5 = pnand %p2536_p10, %p2530_p2 }
0x1696   : > { %2540 = shalt.err (!%p2537_p5)
}
0x1697   : > { %s2658_s29 = smov 2   ;;  %s3335_s11 = smov 32   ;;  %1707 = vst.msk [vmem:[%s3170_s14] sm:$0x3] %vm793_vm3, %v1705_v44 }
0x1698   : > { %2319 = dma.vmem_to_hbm [thread:$0]  (%p3334_p12), %s3178_s15, 256, %s3176_s2, %s1714_s18, %s3335_s11, %s3335_s11, %s2658_s29  }
0x1699   : > { %s3336_s26 = sand.u32 1, %s2732_s13   ;;  %s2541_s24 = scalar_lea.vmem %s3191_s20, 32 }
0x169a   : > { %s3223_s27 = scalar_lea.sflag [#allocation10], %s3336_s26  ;;  %p2542_p7 = scmp.ne.s32.totalorder %s3191_s20, %s2541_s24 }
0x169b   : > { %s2659_s28 = smov [#allocation9]  }
0x169c   : > { %p2543_p9 = pnand %p2542_p7, %p3334_p12  ;;  %s2545_s19 = sshll.u32 %s2659_s28, 4  ;;  %s2546_s19 = int_to_ptr.vmem [resolvable:$false] %s2545_s19 }
0x169d   : > { %s2547_s17 = scalar_lea.vmem %s2546_s19, 64  ;;  %p2548_p3 = scmp.lt.s32.totalorder %s3191_s20, %s2546_s19 }
0x169e   : > { %p2544_p11 = pneg %p2543_p9  ;;  %p2549_p8 = scmp.lt.s32.totalorder %s2547_s17, %s2541_s24 }
0x16a0   : > { %p2550_p0 = por %p2549_p8, %p2548_p3 }
0x16a2   : > { %p2551_p2 = pnand %p2550_p0, %p2544_p11 }
0x16a4   : > { %2554 = shalt.err (!%p2551_p2)
}
0x16a5   : > { %s2555_s2 = scalar_lea.hbm %s3189_s25, 32  ;;  %s2559_s18 = scalar_lea.hbm %s3310_s8, 64 }
0x16a6   : > { %p2556_p4 = scmp.ne.s32.totalorder %s3189_s25, %s2555_s2  ;;  %p2560_p1 = scmp.lt.u32.totalorder %s3189_s25, %s3310_s8 }
0x16a7   : > { %p2561_p10 = scmp.lt.u32.totalorder %s2559_s18, %s2555_s2  ;;  %p2563_p7 = scmp.lt.u32.totalorder %s2555_s2, %s3189_s25 }
0x16a8   : > { %p2557_p6 = pnand %p2556_p4, %p3334_p12 }
0x16a9   : > { %p2562_p5 = por %p2561_p10, %p2560_p1 }
0x16aa   : > { %p2558_p13 = pneg %p2557_p6 }
0x16ab   : > { %p2564_p9 = por %p2563_p7, %p2562_p5 }
0x16ad   : > { %p2565_p11 = pnand %p2564_p9, %p2558_p13 }
0x16af   : > { %2568 = shalt.err (!%p2565_p11)
}
0x16b0   : > { %2320 = dma.vmem_to_hbm [thread:$0]  (%p3334_p12), %s3191_s20, 32, %s3189_s25, %s3223_s27   ;;  %v1710_v45 = vpop.permute.xlu0 %1709 }
0x16b1   : > { %s3337_s11 = sshll.u32 %s2732_s13, 5  ;;  %s3338_s19 = sshll.u32 %s3180_s16, 4  ;;  %1712 = vst.msk [vmem:[%s3180_s16] sm:$0x3] %vm793_vm3, %v1710_v45  ;;  %s3256_s19 = int_to_ptr.vmem [resolvable:$true] %s3338_s19 }
0x16b2   : > { %s3252_s28 = scalar_lea.hbm %s3311_s9, %s3337_s11  ;;  %s2569_s17 = scalar_lea.vmem %s3256_s19, 32 }
0x16b3   : > { %p2570_p3 = scmp.ne.s32.totalorder %s3256_s19, %s2569_s17  ;;  %s2660_s13 = smov [#allocation11]  }
0x16b4   : > { %s2573_s25 = sshll.u32 %s2660_s13, 4  ;;  %s2574_s25 = int_to_ptr.vmem [resolvable:$false] %s2573_s25 }
0x16b5   : > { %p2571_p8 = pnand %p2570_p3, %p3334_p12  ;;  %s2575_s20 = scalar_lea.vmem %s2574_s25, 64 }
0x16b6   : > { %p2576_p2 = scmp.lt.s32.totalorder %s3256_s19, %s2574_s25  ;;  %p2577_p4 = scmp.lt.s32.totalorder %s2575_s20, %s2569_s17 }
0x16b7   : > { %p2572_p0 = pneg %p2571_p8 }
0x16b8   : > { %p2578_p6 = por %p2577_p4, %p2576_p2 }
0x16ba   : > { %p2579_p13 = pnand %p2578_p6, %p2572_p0 }
0x16bc   : > { %2582 = shalt.err (!%p2579_p13)
}
0x16bd   : > { %s2583_s16 = scalar_lea.hbm %s3252_s28, 32  ;;  %s2587_s14 = scalar_lea.hbm %s3311_s9, 64 }
0x16be   : > { %p2584_p1 = scmp.ne.s32.totalorder %s3252_s28, %s2583_s16  ;;  %p2588_p7 = scmp.lt.u32.totalorder %s3252_s28, %s3311_s9 }
0x16bf   : > { %p2589_p9 = scmp.lt.u32.totalorder %s2587_s14, %s2583_s16  ;;  %p2591_p3 = scmp.lt.u32.totalorder %s2583_s16, %s3252_s28 }
0x16c0   : > { %p2585_p10 = pnand %p2584_p1, %p3334_p12 }
0x16c1   : > { %p2590_p11 = por %p2589_p9, %p2588_p7 }
0x16c2   : > { %p2586_p5 = pneg %p2585_p10 }
0x16c3   : > { %p2592_p8 = por %p2591_p3, %p2590_p11 }
0x16c5   : > { %p2593_p0 = pnand %p2592_p8, %p2586_p5 }
0x16c7   : > { %2596 = shalt.err (!%p2593_p0)
}
0x16c8   : > { %2321 = dma.vmem_to_hbm [thread:$0]  (%p3334_p12), %s3256_s19, 32, %s3252_s28, %s3223_s27  }
0x16c9 PF: > { %s1778_s29 = sand.u32 1, %s2631_s30   ;;  %p3339_p2 = scmp.ne.s32.totalorder %s3328_s22, 0 }
0x16ca   : > { %p3340_p4 = scmp.ge.s32.totalorder %s2643_s12, 2  ;;  %s1779_s11 = scalar_lea.sflag [#allocation5], %s1778_s29 }
0x16cc   : > { %p2333_p6 = pnand %p3340_p4, %p3339_p2 }
0x16ce   : > { %2622 = dma.done.wait (!%p2333_p6), %s1779_s11, 256  }
0x16cf   : > { %2624 = vsyncadd (!%p2333_p6), %s1779_s11, 4294967040  ;;  %s3341_s26 = sadd.s32 4294967294, %s2643_s12  }
0x16d0   : > { %s1787_s24 = sand.u32 1, %s3341_s26  }
0x16d1   : > { %s1788_s17 = scalar_lea.sflag [#allocation10], %s1787_s24 }
0x16d2   : > { %2626 = dma.done.wait (!%p2333_p6), %s1788_s17, 64  }
0x16d3   : > { %2628 = vsyncadd (!%p2333_p6), %s1788_s17, 4294967232  ;;  %s3342_s12 = sld [smem:[#allocation17_spill]]  ;;  %s3343_s21 = sld [smem:[#allocation16_spill]] }
0x16d4   : > { %s3344_s11 = sld [smem:[#allocation18_spill]]  ;;  %s3345_s30 = smov %s2635_s10 }
0x16d9   : > { %p29_p12 = scmp.ge.s32.totalorder %s3342_s12, 4   ;;  %s3346_s10 = smov %s3343_s21 }
0x16db   :  { %31 = sbr.rel (!%p29_p12) target bundleno = 11 (0xb), region = 171 }
0x16e2   :  { %1802 = vsyncpa [#allocation4], 1 }
0x16e3   :  { %1804 = vsyncpa [#allocation4 + $0x1], 1 }
0x16e4   :  { %1805 = vsyncpa [#allocation7], 1 }
0x16e5   :  { %1807 = vsyncpa [#allocation7 + $0x1], 1 }
0x16e6   :  { %1808 = vsyncpa [#allocation5], 1 }
0x16e7   :  { %1810 = vsyncpa [#allocation5 + $0x1], 1 }
0x16e8   :  { %1811 = vsyncpa [#allocation10], 1 }
0x16e9   :  { %1813 = vsyncpa [#allocation10 + $0x1], 1 }

</bundles_post_ra>
